<compile_context>
chip_gen: v6e
topology: v6e:2x2x1
jax: 0.10.0
libtpu: 0.0.40
codegen_flags: <defaults>
</compile_context>

<pallas_src>
import functools

import jax
import jax.numpy as jnp
import numpy as np
from jax.experimental import pallas as pl
from jax.experimental.pallas import tpu as pltpu


def _reorg_kernel(x_ref, o_ref, *, stride):
    # x_ref: (Cb, H, W)           one channel block of one batch element
    # o_ref: (S, Cb, Ho*Wo)       S = stride*stride, lane-dense output slabs
    cb, h, w = x_ref.shape
    ho = h // stride
    wo = w // stride
    for p in range(stride):
        # Row (H) de-interleave: sublane-strided read. Keeps the HBM->VMEM DMA
        # of the whole (Cb, H, W) block fully contiguous.
        xp = x_ref[:, pl.ds(p, ho, stride=stride), :]            # (Cb, Ho, W)
        # Column (W) de-interleave: the only cross-lane regroup in the kernel.
        xpq = xp.reshape(cb, ho, wo, stride)                     # (Cb, Ho, Wo, s)
        for q in range(stride):
            # Lane-dense store: minor dim is Ho*Wo, not Wo -> unmasked vst.
            o_ref[p * stride + q, :, :] = xpq[:, :, :, q].reshape(cb, ho * wo)


def _physical_vmem_bytes():
    """Best-effort physical VMEM query; default to the v5e/v6e 128 MiB."""
    try:
        info = pltpu.get_tpu_info()
        v = getattr(info, "vmem_capacity_bytes", None)
        if v:
            return int(v)
    except Exception:
        pass
    return 128 * 1024 * 1024


def _tile_budget_bytes(phys_vmem_bytes):
    """Per-tile budget; live VMEM ~= 4 * tile (2 dbl-buffered in + 2 out)."""
    if phys_vmem_bytes <= 64 * 1024 * 1024:     # v7x-class: 64 MiB physical
        return 5 * 1024 * 1024                  # ~20 MiB live
    return 7 * 1024 * 1024                      # v5e/v6e: ~28 MiB live


def _vmem_limit_bytes(phys_vmem_bytes):
    """Scoped-VMEM request with headroom below physical capacity."""
    if phys_vmem_bytes <= 64 * 1024 * 1024:     # v7x: never request full 64 MiB
        return 48 * 1024 * 1024
    return 64 * 1024 * 1024                     # v5e/v6e: 128 MiB physical


def _pick_channel_block(C, plane_bytes, budget_bytes):
    """Channel block size Cb.

    The blocked out_spec's second-to-last dim is Cb, so when Cb < C it must be
    a multiple of 8 (sublane tiling).  Prefer exact divisors of C (no ragged
    last block); fall back to a ragged cdiv grid when C has no usable divisor
    near the budget, so awkward C never collapses to tiny per-plane DMAs.
    """
    if C * plane_bytes <= budget_bytes:
        return C
    cap = max(1, budget_bytes // plane_bytes)
    if cap >= C:
        return C
    cb_cap = min(max(8, (cap // 8) * 8), C)
    if cb_cap == C:
        return C
    for d in range(cb_cap, 7, -1):
        if d % 8 == 0 and C % d == 0:
            if 4 * d >= cb_cap:          # exact divisor, not pathologically small
                return d
            break
    return cb_cap                        # ragged last block (masked by Pallas)


def reorg(x, stride=2, *, max_block_bytes=None):
    """Pallas implementation of the Darknet Reorg layer (NCHW in / NCHW out)."""
    assert x.ndim == 4
    B, C, H, W = x.shape
    assert H % stride == 0
    assert W % stride == 0
    S = stride * stride
    Ho, Wo = H // stride, W // stride
    HWo = Ho * Wo
    itemsize = jnp.dtype(x.dtype).itemsize
    plane_bytes = H * W * itemsize

    phys_vmem = _physical_vmem_bytes()
    budget = max_block_bytes if max_block_bytes is not None else _tile_budget_bytes(phys_vmem)
    Cb = _pick_channel_block(C, plane_bytes, budget)
    n_cblk = pl.cdiv(C, Cb)

    # v7x has 2 TensorCores sharing HBM: make sure a single-batch call still
    # yields >= 2 parallel grid steps when C splits cleanly into 8-multiples.
    if B * n_cblk < 2 and C % 16 == 0:
        Cb = C // 2
        n_cblk = 2

    kernel = functools.partial(_reorg_kernel, stride=stride)

    out4 = pl.pallas_call(
        kernel,
        out_shape=jax.ShapeDtypeStruct((B, S, C, HWo), x.dtype),
        grid=(B, n_cblk),
        in_specs=[
            pl.BlockSpec(
                (pl.Squeezed(), Cb, H, W),
                lambda b, c: (b, c, 0, 0),
            )
        ],
        out_specs=pl.BlockSpec(
            (pl.Squeezed(), S, Cb, HWo),
            lambda b, c: (b, 0, c, 0),
        ),
        compiler_params=pltpu.CompilerParams(
            dimension_semantics=("parallel", "parallel"),
            vmem_limit_bytes=_vmem_limit_bytes(phys_vmem),
        ),
        cost_estimate=pl.CostEstimate(
            flops=0,
            transcendentals=0,
            bytes_accessed=int(2 * B * C * H * W * itemsize),
        ),
    )(x)

    # Free row-major view: (B, S, C, Ho*Wo) -> (B, S*C, Ho, Wo)  (PyTorch layout).
    return out4.reshape(B, S * C, Ho, Wo)


def reorg_ref(x, stride=2):
    """Pure-JAX reference mirroring the PyTorch code exactly."""
    B, C, H, W = x.shape
    hs = ws = stride
    y = x.reshape(B, C, H // hs, hs, W // ws, ws).transpose(0, 1, 2, 4, 3, 5)
    y = y.reshape(B, C, (H // hs) * (W // ws), hs * ws).transpose(0, 1, 3, 2)
    y = y.reshape(B, C, hs * ws, H // hs, W // ws).transpose(0, 2, 1, 3, 4)
    return y.reshape(B, hs * ws * C, H // hs, W // ws)


if __name__ == "__main__":
    key = jax.random.PRNGKey(0)

    # Test 1: module-default config, whole-C tile path.
    B, C, H, W = 2, 4, 16, 16
    x = jax.random.normal(key, (B, C, H, W), dtype=jnp.float32)
    expected = reorg_ref(x, stride=2)
    out = jax.block_until_ready(reorg(x, stride=2))
    assert out.shape == (B, 4 * C, H // 2, W // 2), out.shape
    np.testing.assert_array_equal(np.asarray(out), np.asarray(expected))

    # Test 2: force channel blocking (Cb=8, n_cblk=2) to exercise the blocked
    # out_spec path (second-to-last block dim = 8, a strict sub-block of C).
    B2, C2, H2, W2 = 2, 16, 8, 8
    x2 = jax.random.normal(jax.random.PRNGKey(1), (B2, C2, H2, W2), dtype=jnp.float32)
    expected2 = reorg_ref(x2, stride=2)
    out2 = jax.block_until_ready(
        reorg(x2, stride=2, max_block_bytes=8 * H2 * W2 * x2.dtype.itemsize)
    )
    np.testing.assert_array_equal(np.asarray(out2), np.asarray(expected2))

    print("KERNEL_OK")
</pallas_src>

<mosaic_0001>
module attributes {stable_mosaic.version = 11 : i64} {
  func.func @_reorg_kernel(%arg0: i32, %arg1: i32, %arg2: memref<1x4x16x16xf32, #tpu.memory_space<vmem>>, %arg3: memref<1x4x4x64xf32, #tpu.memory_space<vmem>>) attributes {dimension_semantics = [#tpu.dimension_semantics<parallel>, #tpu.dimension_semantics<parallel>], iteration_bounds = array<i64: 2, 1>, scalar_prefetch = 0 : i64, scratch_operands = 0 : i64, tpu.core_type = #tpu.core_type<tc>, window_params = [{transform_indices = @transform_0, window_bounds = array<i64: 1, 4, 16, 16>}, {transform_indices = @transform_1, window_bounds = array<i64: 1, 4, 4, 64>}]} {
    %c0 = arith.constant 0 : index
    %c0_0 = arith.constant 0 : index
    %c0_1 = arith.constant 0 : index
    %c0_2 = arith.constant 0 : index
    %0 = tpu.strided_load %arg2[%c0, %c0_0, %c0_1, %c0_2] {strides = array<i32: 1, 1, 2, 1>} : memref<1x4x16x16xf32, #tpu.memory_space<vmem>>, vector<1x4x8x16xf32>
    %1 = vector.shape_cast %0 : vector<1x4x8x16xf32> to vector<4x8x16xf32>
    %2 = vector.shape_cast %1 : vector<4x8x16xf32> to vector<4x8x8x2xf32>
    %3 = vector.extract_strided_slice %2 {offsets = [0, 0, 0, 0], sizes = [4, 8, 8, 1], strides = [1, 1, 1, 1]} : vector<4x8x8x2xf32> to vector<4x8x8x1xf32>
    %4 = vector.shape_cast %3 : vector<4x8x8x1xf32> to vector<4x8x8xf32>
    %5 = vector.shape_cast %4 : vector<4x8x8xf32> to vector<4x64xf32>
    %c0_3 = arith.constant 0 : index
    %c0_4 = arith.constant 0 : index
    %c0_5 = arith.constant 0 : index
    %c0_6 = arith.constant 0 : index
    %6 = vector.load %arg3[%c0_3, %c0_4, %c0_5, %c0_6] : memref<1x4x4x64xf32, #tpu.memory_space<vmem>>, vector<1x1x4x64xf32>
    %7 = vector.shape_cast %6 : vector<1x1x4x64xf32> to vector<4x64xf32>
    %8 = vector.shape_cast %5 : vector<4x64xf32> to vector<1x1x4x64xf32>
    tpu.vector_store %arg3[%c0_3, %c0_4, %c0_5, %c0_6], %8 {strides = array<i32>} : memref<1x4x4x64xf32, #tpu.memory_space<vmem>>, vector<1x1x4x64xf32>,
    %9 = vector.extract_strided_slice %2 {offsets = [0, 0, 0, 1], sizes = [4, 8, 8, 1], strides = [1, 1, 1, 1]} : vector<4x8x8x2xf32> to vector<4x8x8x1xf32>
    %10 = vector.shape_cast %9 : vector<4x8x8x1xf32> to vector<4x8x8xf32>
    %11 = vector.shape_cast %10 : vector<4x8x8xf32> to vector<4x64xf32>
    %c0_7 = arith.constant 0 : index
    %c1 = arith.constant 1 : index
    %c0_8 = arith.constant 0 : index
    %c0_9 = arith.constant 0 : index
    %12 = vector.load %arg3[%c0_7, %c1, %c0_8, %c0_9] : memref<1x4x4x64xf32, #tpu.memory_space<vmem>>, vector<1x1x4x64xf32>
    %13 = vector.shape_cast %12 : vector<1x1x4x64xf32> to vector<4x64xf32>
    %14 = vector.shape_cast %11 : vector<4x64xf32> to vector<1x1x4x64xf32>
    tpu.vector_store %arg3[%c0_7, %c1, %c0_8, %c0_9], %14 {strides = array<i32>} : memref<1x4x4x64xf32, #tpu.memory_space<vmem>>, vector<1x1x4x64xf32>,
    %c0_10 = arith.constant 0 : index
    %c0_11 = arith.constant 0 : index
    %c1_12 = arith.constant 1 : index
    %c0_13 = arith.constant 0 : index
    %15 = tpu.strided_load %arg2[%c0_10, %c0_11, %c1_12, %c0_13] {strides = array<i32: 1, 1, 2, 1>} : memref<1x4x16x16xf32, #tpu.memory_space<vmem>>, vector<1x4x8x16xf32>
    %16 = vector.shape_cast %15 : vector<1x4x8x16xf32> to vector<4x8x16xf32>
    %17 = vector.shape_cast %16 : vector<4x8x16xf32> to vector<4x8x8x2xf32>
    %18 = vector.extract_strided_slice %17 {offsets = [0, 0, 0, 0], sizes = [4, 8, 8, 1], strides = [1, 1, 1, 1]} : vector<4x8x8x2xf32> to vector<4x8x8x1xf32>
    %19 = vector.shape_cast %18 : vector<4x8x8x1xf32> to vector<4x8x8xf32>
    %20 = vector.shape_cast %19 : vector<4x8x8xf32> to vector<4x64xf32>
    %c0_14 = arith.constant 0 : index
    %c2 = arith.constant 2 : index
    %c0_15 = arith.constant 0 : index
    %c0_16 = arith.constant 0 : index
    %21 = vector.load %arg3[%c0_14, %c2, %c0_15, %c0_16] : memref<1x4x4x64xf32, #tpu.memory_space<vmem>>, vector<1x1x4x64xf32>
    %22 = vector.shape_cast %21 : vector<1x1x4x64xf32> to vector<4x64xf32>
    %23 = vector.shape_cast %20 : vector<4x64xf32> to vector<1x1x4x64xf32>
    tpu.vector_store %arg3[%c0_14, %c2, %c0_15, %c0_16], %23 {strides = array<i32>} : memref<1x4x4x64xf32, #tpu.memory_space<vmem>>, vector<1x1x4x64xf32>,
    %24 = vector.extract_strided_slice %17 {offsets = [0, 0, 0, 1], sizes = [4, 8, 8, 1], strides = [1, 1, 1, 1]} : vector<4x8x8x2xf32> to vector<4x8x8x1xf32>
    %25 = vector.shape_cast %24 : vector<4x8x8x1xf32> to vector<4x8x8xf32>
    %26 = vector.shape_cast %25 : vector<4x8x8xf32> to vector<4x64xf32>
    %c0_17 = arith.constant 0 : index
    %c3 = arith.constant 3 : index
    %c0_18 = arith.constant 0 : index
    %c0_19 = arith.constant 0 : index
    %27 = vector.load %arg3[%c0_17, %c3, %c0_18, %c0_19] : memref<1x4x4x64xf32, #tpu.memory_space<vmem>>, vector<1x1x4x64xf32>
    %28 = vector.shape_cast %27 : vector<1x1x4x64xf32> to vector<4x64xf32>
    %29 = vector.shape_cast %26 : vector<4x64xf32> to vector<1x1x4x64xf32>
    tpu.vector_store %arg3[%c0_17, %c3, %c0_18, %c0_19], %29 {strides = array<i32>} : memref<1x4x4x64xf32, #tpu.memory_space<vmem>>, vector<1x1x4x64xf32>,
    return
  }
  func.func @transform_0(%arg0: i32, %arg1: i32) -> (i32, i32, i32, i32) {
    %c0_i32 = arith.constant 0 : i32
    %c0_i32_0 = arith.constant 0 : i32
    %c0_i32_1 = arith.constant 0 : i32
    return %arg0, %arg1, %c0_i32, %c0_i32_0 : i32, i32, i32, i32
  }
  func.func @transform_1(%arg0: i32, %arg1: i32) -> (i32, i32, i32, i32) {
    %c0_i32 = arith.constant 0 : i32
    %c0_i32_0 = arith.constant 0 : i32
    %c0_i32_1 = arith.constant 0 : i32
    return %arg0, %c0_i32, %arg1, %c0_i32_0 : i32, i32, i32, i32
  }
}

</mosaic_0001>

<bundles_post_ra>
// kernel: tpu_custom_call.1
= control target key start
LH: loop header
LB: loop body
LE: loop exit
PB: predicated region body
PF: predicated region fallthrough
CT: control target
= control target key end

     0   :  { %6 = vsyncpa [#allocation3], 0  ;;  %s4125_s0 = inlined_call_operand.hbm [shape: f32[2,4,16,16], index: 0, kind: input, shape index: {}]   ;;  %s4126_s1 = inlined_call_operand.hbm [shape: f32[2,4,4,64], index: 1, kind: output, shape index: {}]  }
   0x1   :  { %8 = vsyncpa [#allocation3 + $0x1], 0 }
   0x2   :  { %9 = vsyncpa [#allocation4], 0 }
   0x3   :  { %11 = vsyncpa [#allocation4 + $0x1], 0  ;;  %s2897_s6 = smov 0   ;;  %s2899_s7 = smov 0  }
   0x4   :  { %s2901_s8 = smov 0   ;;  %s2903_s9 = smov 0  }
   0x5   :  { %s2905_s10 = smov 0   ;;  %s2907_s11 = smov 0  }
   0x6 LB: > { %s2650_s12 = sadd.s32 4294967295, %s2868_s11   ;;  %s2651_s13 = sadd.s32 4294967294, %s2868_s11   ;;  %s2868_s11 = sphi %s2907_s11, %s17_s11   ;;  %s2864_s10 = sphi %s2905_s10, %s4210_s10   ;;  %s2860_s9 = sphi %s2903_s9, %s4209_s9   ;;  %s2856_s8 = sphi %s2901_s8, %s4208_s8   ;;  %s2852_s7 = sphi %s2899_s7, %s4207_s7   ;;  %s2848_s6 = sphi %s2897_s6, %s4206_s6  }
   0x7   : > { %s29_s14 = sadd.s32 1, %s2864_s10  ;;  %s38_s15 = sadd.s32 1, %s2856_s8 }
   0x8   : > { %p31_p0 = scmp.ge.s32.totalorder %s29_s14, 2  ;;  %p45_p1 = scmp.ne.s32.totalorder %s2856_s8, %s2852_s7 }
   0x9   : > { %p46_p2 = scmp.eq.s32.totalorder %s2868_s11, 0  ;;  %p51_p3 = scmp.ne.s32.totalorder %s2852_s7, %s2848_s6 }
   0xa   : > { %s4212_s14 = smov (%p31_p0, %s29_s14), 0  ;;  %p52_p5 = scmp.eq.s32.totalorder %s2650_s12, 0 }
   0xb   : > { %p2938_p4 = por %p46_p2, %p45_p1  ;;  %s33_s17 = ssub.s32 %s2864_s10, %s4212_s14 }
   0xc   : > { %p77_p6 = scmp.eq.s32.totalorder %s2650_s12, 1  ;;  %p36_p7 = scmp.eq.s32.totalorder %s33_s17, 0 }
   0xd   : > { %p2944_p8 = por %p52_p5, %p51_p3  ;;  %p83_p10 = scmp.eq.s32.totalorder %s2651_s13, 1 }
   0xe   : > { %p2948_p9 = por %p77_p6, %p45_p1  ;;  %p2689_p13 = scmp.lt.s32.totalorder %s2868_s11, 2 }
   0xf   : > { %s2953_s20 = scalar_select %p36_p7, %s2856_s8, %s38_s15  }
  0x10   : > { %p2955_p11 = por %p83_p10, %p51_p3  ;;  %s103_s22 = sand.u32 1, %s2856_s8  }
  0x11   : > { %s2654_s23 = sshll.u32 %s103_s22, 6  ;;  %s2675_s24 = sshll.u32 %s2864_s10, 10 }
  0x12   : > { %s116_s27 = scalar_lea.hbm %s4125_s0, %s2675_s24  ;;  %s107_s28 = scalar_lea.vmem [#allocation2], %s2654_s23 }
  0x13   : > { %s117_s29 = sshll.u32 %s107_s28, 4  ;;  %p2968_p0 = pnand %p2689_p13, %p2938_p4  ;;  %s118_s29 = int_to_ptr.vmem [resolvable:$true] %s117_s29 }
  0x14   : > { %p2657_p1 = scmp.ge.s32.totalorder %s2868_s11, 1  ;;  %s104_s2 = scalar_lea.sflag [#allocation3], %s103_s22 }
  0x15   : > { %p2762_p2 = pneg %p2968_p0  ;;  %s2773_s3 = scalar_lea.vmem %s118_s29, 1024 }
  0x16   : > { %p2774_p3 = scmp.ne.s32.totalorder %s118_s29, %s2773_s3  ;;  %s2870_s4 = smov [#allocation2]  }
  0x17   : > { %s2778_s5 = sshll.u32 %s2870_s4, 4  ;;  %s2779_s5 = int_to_ptr.vmem [resolvable:$false] %s2778_s5 }
  0x18   : > { %p2776_p5 = pnand %p2774_p3, %p2762_p2  ;;  %s2780_s12 = scalar_lea.vmem %s2779_s5, 2048 }
  0x19   : > { %p2781_p7 = scmp.lt.s32.totalorder %s118_s29, %s2779_s5  ;;  %p2782_p10 = scmp.lt.s32.totalorder %s2780_s12, %s2773_s3 }
  0x1a   : > { %p2777_p6 = pneg %p2776_p5 }
  0x1b   : > { %p2783_p12 = por %p2782_p10, %p2781_p7 }
  0x1d   : > { %p2784_p4 = pnand %p2783_p12, %p2777_p6 }
  0x1f   : > { %2787 = shalt.err (!%p2784_p4)
}
  0x20   : > { %s2871_s13 = smov 128   ;;  %s2872_s15 = smov 8  }
  0x21   : > { %2684 = dma.hbm_to_vmem [thread:$0]  (!%p2968_p0), %s116_s27, 1024, %s118_s29, %s104_s2, %s2871_s13, %s2871_s13, %s2872_s15  }
  0x22   : > { %p125_p13 = scmp.lt.s32.totalorder %s2868_s11, 3 }
  0x24   : > { %p126_p2 = pnand %p2657_p1, %p125_p13 }
  0x26   : > { %129 = sbr.rel (%p126_p2) target bundleno = 845 (0x34d), region = 24 }
  0x2b   : > { %s2981_s16 = sand.u32 1, %s2852_s7  }
  0x2c   : > { %s2658_s17 = sshll.u32 %s2981_s16, 6  ;;  %s132_s22 = scalar_lea.sflag [#allocation3], %s2981_s16 }
  0x2d   : > { %s2985_s23 = scalar_lea.vmem [#allocation2], %s2658_s17 }
  0x2e   : > { %2839 = dma.done.wait (%p2944_p8), %s132_s22, 1024  }
  0x2f   : > { %2841 = vsyncadd (%p2944_p8), %s132_s22, 4294966272  ;;  %v2992_v0 = vld [vmem:[%s2985_s23 + $0x20] ss:$2 sm:$0xff]  ;;  %s2873_s24 = smov 126   ;;  %v3002_v2 = vld [vmem:[%s2985_s23 + $0x30] ss:$2 sm:$0xff]  ;;  %v255_v27 = vlaneseq }
  0x30   : > { %v2995_v1 = vld [vmem:[%s2985_s23] ss:$2 sm:$0xff]  ;;  %170 = vrot.lane.b32.xlu1 %v2992_v0, %s2873_s24  ;;  %v3005_v3 = vld [vmem:[%s2985_s23 + $0x10] ss:$2 sm:$0xff]  ;;  %s2874_s18 = smov 124   ;;  %s2875_s25 = smov 122  }
  0x31   : > { %166 = vrot.lane.b32.xlu0 %v2995_v1, %s2873_s24  ;;  %s2876_s26 = smov 120   ;;  %s2877_s27 = smov 118   ;;  %v2879_v4 = vmov 0   ;;  %v2881_v25 = vmov 1983009808   ;;  %v3092_v30 = vshrl.u32 %v255_v27, 7 }
  0x32   : > { %s2878_s28 = smov 116   ;;  %2755 = vset.pattern.permute.xlu1 %v2879_v4  ;;  %2754 = vset.pattern.permute.xlu0 %v2879_v4  ;;  %s2880_s29 = smov 114   ;;  %v253_v26 = vunpack.c.l.s4 %v2881_v25  ;;  %v2882_v34 = vmov 1934713408   ;;  %vm933_vm0 = vcmask 130112   ;;  %vm940_vm1 = vcmask 195712  }
  0x33   : > { %v317_v35 = vunpack.c.l.s4 %v2882_v34  ;;  %vm947_vm2 = vcmask 261312   ;;  %vm954_vm3 = vcmask 326912   ;;  %vm961_vm4 = vcmask 392512   ;;  %s2659_s30 = sshll.u32 %s2981_s16, 4  ;;  %s2676_s3 = sshll.u32 %s2860_s9, 8 }
  0x34   : > { %172 = vrot.lane.b32.xlu1 %v3002_v2, %s2873_s24  ;;  %v254_v29 = vunpack.c.0.s8 %v253_v26  ;;  %vm968_vm5 = vcmask 458112   ;;  %vm975_vm6 = vcmask 523712   ;;  %vm1094_vm7 = vcmask 1041409   ;;  %s3516_s2 = scalar_lea.vmem [#allocation5], %s2659_s30  ;;  %s4070_s12 = scalar_lea.hbm %s4126_s1, %s2676_s3 }
  0x35   : > { %168 = vrot.lane.b32.xlu0 %v3005_v3, %s2873_s24  ;;  %v318_v42 = vunpack.c.0.s8 %v317_v35  ;;  %vm1096_vm8 = vcmask 1042434   ;;  %vm1098_vm9 = vcmask 1043459   ;;  %vm1101_vm10 = vcmask 519168   ;;  %s2564_s4 = sshll.u32 %s3516_s2, 4  ;;  %s2550_s13 = scalar_lea.sflag [#allocation4], %s2981_s16  ;;  %s4072_s4 = int_to_ptr.vmem [resolvable:$true] %s2564_s4 }
  0x36   : > { %v3099_v36 = vsub.s32 %v254_v29, %v3092_v30  ;;  %s2788_s15 = scalar_lea.vmem %s4072_s4, 256  ;;  %s2884_s17 = smov [#allocation5]  }
  0x37   : > { %v3109_v51 = vsub.s32 %v318_v42, %v3092_v30  ;;  %p2789_p8 = scmp.ne.s32.totalorder %s4072_s4, %s2788_s15  ;;  %s2792_s22 = sshll.u32 %s2884_s17, 4  ;;  %s2793_s22 = int_to_ptr.vmem [resolvable:$false] %s2792_s22 }
  0x38   : > { %180 = vrot.lane.b32.xlu1 %v3005_v3, %s2874_s18  ;;  %p2795_p1 = scmp.lt.s32.totalorder %s4072_s4, %s2793_s22 }
  0x39   : > { %178 = vrot.lane.b32.xlu0 %v2995_v1, %s2874_s18  ;;  %p2790_p12 = pnand %p2789_p8, %p2948_p9 }
  0x3b   : > { %p2791_p0 = pneg %p2790_p12 }
  0x3c   : > { %184 = vrot.lane.b32.xlu1 %v3002_v2, %s2874_s18 }
  0x3d   : > { %182 = vrot.lane.b32.xlu0 %v2992_v0, %s2874_s18 }
  0x40   : > { %192 = vrot.lane.b32.xlu1 %v3005_v3, %s2875_s25 }
  0x41   : > { %190 = vrot.lane.b32.xlu0 %v2995_v1, %s2875_s25 }
  0x44   : > { %196 = vrot.lane.b32.xlu1 %v3002_v2, %s2875_s25 }
  0x45   : > { %194 = vrot.lane.b32.xlu0 %v2992_v0, %s2875_s25 }
  0x48   : > { %204 = vrot.lane.b32.xlu1 %v3005_v3, %s2876_s26 }
  0x49   : > { %202 = vrot.lane.b32.xlu0 %v2995_v1, %s2876_s26 }
  0x4c   : > { %208 = vrot.lane.b32.xlu1 %v3002_v2, %s2876_s26 }
  0x4d   : > { %206 = vrot.lane.b32.xlu0 %v2992_v0, %s2876_s26 }
  0x50   : > { %216 = vrot.lane.b32.xlu1 %v3005_v3, %s2877_s27 }
  0x51   : > { %214 = vrot.lane.b32.xlu0 %v2995_v1, %s2877_s27 }
  0x54   : > { %220 = vrot.lane.b32.xlu1 %v3002_v2, %s2877_s27 }
  0x55   : > { %218 = vrot.lane.b32.xlu0 %v2992_v0, %s2877_s27 }
  0x58   : > { %228 = vrot.lane.b32.xlu1 %v3005_v3, %s2878_s28 }
  0x59   : > { %226 = vrot.lane.b32.xlu0 %v2995_v1, %s2878_s28 }
  0x5c   : > { %232 = vrot.lane.b32.xlu1 %v3002_v2, %s2878_s28 }
  0x5d   : > { %230 = vrot.lane.b32.xlu0 %v2992_v0, %s2878_s28 }
  0x60   : > { %240 = vrot.lane.b32.xlu1 %v3005_v3, %s2880_s29 }
  0x61   : > { %238 = vrot.lane.b32.xlu0 %v2995_v1, %s2880_s29 }
  0x64   : > { %244 = vrot.lane.b32.xlu1 %v3002_v2, %s2880_s29 }
  0x65   : > { %242 = vrot.lane.b32.xlu0 %v2992_v0, %s2880_s29 }
  0xa2   : > { %v3061_v5 = vpop.permute.xlu1 %170 }
  0xa3   : > { %v167_v6 = vpop.permute.xlu0 %166 }
  0xa6   : > { %v3063_v7 = vpop.permute.xlu1 %172 }
  0xa7   : > { %v3065_v8 = vpop.permute.xlu0 %168 }
  0xaa   : > { %v3067_v9 = vpop.permute.xlu1 %180 }
  0xab   : > { %v179_v10 = vpop.permute.xlu0 %178 }
  0xac   : > { %v250_v37 = vcombine.low %v2995_v1, %v179_v10  ;;  %v251_v52 = vcombine.high %v2995_v1, %v179_v10 }
  0xae   : > { %v3069_v11 = vpop.permute.xlu1 %184  ;;  %v258_v44 = vrot.slane %v250_v37, %v3099_v36  ;;  %v265_v62 = vrot.slane %v251_v52, %v3099_v36 }
  0xaf   : > { %v3071_v12 = vpop.permute.xlu0 %182 }
  0xb2   : > { %v3073_v13 = vpop.permute.xlu1 %192 }
  0xb3   : > { %v191_v14 = vpop.permute.xlu0 %190 }
  0xb4   : > { %v266_v32 = vcombine.low %v167_v6, %v191_v14  ;;  %v267_v46 = vcombine.high %v167_v6, %v191_v14 }
  0xb6   : > { %v3075_v15 = vpop.permute.xlu1 %196  ;;  %v274_v38 = vrot.slane %v266_v32, %v3099_v36  ;;  %v281_v57 = vrot.slane %v267_v46, %v3099_v36 }
  0xb7   : > { %v3077_v16 = vpop.permute.xlu0 %194 }
  0xb8   : > { %v314_v48 = vcombine.low %v258_v44, %v274_v38  ;;  %v315_v58 = vcombine.high %v258_v44, %v274_v38  ;;  %v330_v25 = vcombine.low %v265_v62, %v281_v57 }
  0xba   : > { %v3079_v17 = vpop.permute.xlu1 %204  ;;  %v322_v60 = vrot.slane %v314_v48, %v3109_v51  ;;  %v387_v48 = vcombine.high %v3005_v3, %v3067_v9 }
  0xbb   : > { %v203_v18 = vpop.permute.xlu0 %202 }
  0xbe   : > { %v3081_v19 = vpop.permute.xlu1 %208 }
  0xbf   : > { %v3083_v20 = vpop.permute.xlu0 %206 }
  0xc2   : > { %v3085_v21 = vpop.permute.xlu1 %216 }
  0xc3   : > { %v215_v22 = vpop.permute.xlu0 %214 }
  0xc6   : > { %v3087_v23 = vpop.permute.xlu1 %220 }
  0xc7   : > { %v3089_v24 = vpop.permute.xlu0 %218 }
  0xca   : > { %v3094_v31 = vpop.permute.xlu1 %228 }
  0xcb   : > { %v227_v28 = vpop.permute.xlu0 %226  ;;  %v418_v26 = vcombine.low %v3079_v17, %v3094_v31 }
  0xcc   : > { %v282_v39 = vcombine.low %v203_v18, %v227_v28  ;;  %v283_v49 = vcombine.high %v203_v18, %v227_v28  ;;  %v386_v18 = vcombine.low %v3005_v3, %v3067_v9  ;;  %v329_v28 = vrot.slane %v315_v58, %v3109_v51 }
  0xcd   : > { %v426_v42 = vrot.slane %v418_v26, %v3099_v36  ;;  %v401_v9 = vrot.slane %v387_v48, %v3099_v36 }
  0xce   : > { %v3103_v40 = vpop.permute.xlu1 %232  ;;  %v290_v50 = vrot.slane %v282_v39, %v3099_v36  ;;  %v297_v59 = vrot.slane %v283_v49, %v3099_v36  ;;  %v394_v37 = vrot.slane %v386_v18, %v3099_v36 }
  0xcf   : > { %v3096_v33 = vpop.permute.xlu0 %230 }
  0xd0   : > { %v554_v18 = vcombine.low %v3083_v20, %v3096_v33 }
  0xd2   : > { %v241_v53 = vpop.permute.xlu1 %240 }
  0xd3   : > { %v239_v41 = vpop.permute.xlu0 %238  ;;  %v434_v63 = vcombine.low %v3085_v21, %v241_v53  ;;  %v435_v44 = vcombine.high %v3085_v21, %v241_v53 }
  0xd4   : > { %v298_v43 = vcombine.low %v215_v22, %v239_v41  ;;  %v299_v45 = vcombine.high %v215_v22, %v239_v41  ;;  %v402_v22 = vcombine.low %v3065_v8, %v3073_v13  ;;  %v331_v41 = vcombine.high %v265_v62, %v281_v57 }
  0xd5   : > { %v442_v29 = vrot.slane %v434_v63, %v3099_v36  ;;  %v449_v53 = vrot.slane %v435_v44, %v3099_v36 }
  0xd6   : > { %v306_v47 = vrot.slane %v298_v43, %v3099_v36  ;;  %v313_v54 = vrot.slane %v299_v45, %v3099_v36  ;;  %v410_v39 = vrot.slane %v402_v22, %v3099_v36  ;;  %v338_v43 = vrot.slane %v330_v25, %v3109_v51 }
  0xd7   : > { %v482_v45 = vcombine.low %v426_v42, %v442_v29  ;;  %v345_v21 = vrot.slane %v331_v41, %v3109_v51  ;;  %v522_v25 = vcombine.low %v2992_v0, %v3071_v12  ;;  %v562_v41 = vrot.slane %v554_v18, %v3099_v36 }
  0xd8   : > { %v346_v55 = vcombine.low %v290_v50, %v306_v47  ;;  %v347_v56 = vcombine.high %v290_v50, %v306_v47  ;;  %v362_v6 = vcombine.low %v297_v59, %v313_v54  ;;  %v363_v32 = vcombine.high %v297_v59, %v313_v54 }
  0xd9   : > { %v403_v50 = vcombine.high %v3065_v8, %v3073_v13  ;;  %v450_v52 = vcombine.low %v394_v37, %v410_v39  ;;  %v419_v54 = vcombine.high %v3079_v17, %v3094_v31  ;;  %v490_v3 = vrot.slane %v482_v45, %v3109_v51  ;;  %v243_v8 = vpop.permute.xlu0 %242 }
  0xda   : > { %v354_v61 = vrot.slane %v346_v55, %v3109_v51  ;;  %v361_v14 = vrot.slane %v347_v56, %v3109_v51  ;;  %v370_v35 = vrot.slane %v362_v6, %v3109_v51  ;;  %v377_v47 = vrot.slane %v363_v32, %v3109_v51 }
  0xdb   : > { %v483_v55 = vcombine.high %v426_v42, %v442_v29  ;;  %v417_v17 = vrot.slane %v403_v50, %v3099_v36  ;;  %v451_v31 = vcombine.high %v394_v37, %v410_v39  ;;  %v433_v57 = vrot.slane %v419_v54, %v3099_v36 }
  0xdc   : > { %v3119_v1 = vcombine.high %v322_v60, %v354_v61  ;;  %v3121_v10 = vcombine.low %v322_v60, %v354_v61  ;;  %v3134_v34 = vcombine.low %v329_v28, %v361_v14  ;;  %v3138_v38 = vcombine.high %v329_v28, %v361_v14 }
  0xdd   : > { %v3146_v46 = vcombine.low %v338_v43, %v370_v35  ;;  %v3151_v49 = vcombine.high %v338_v43, %v370_v35  ;;  %v3161_v56 = vcombine.low %v345_v21, %v377_v47  ;;  %v3165_v13 = vcombine.high %v345_v21, %v377_v47 }
  0xde   : > { %830 = vperm.xlu1 %2755, %v3119_v1   ;;  %827 = vperm.xlu0 %2754, %v3121_v10   ;;  %v458_v58 = vrot.slane %v450_v52, %v3109_v51  ;;  %v498_v59 = vcombine.low %v433_v57, %v449_v53  ;;  %v570_v60 = vcombine.low %v3089_v24, %v243_v8 }
  0xdf   : > { %v497_v62 = vrot.slane %v483_v55, %v3109_v51  ;;  %v466_v6 = vcombine.low %v401_v9, %v417_v17  ;;  %v538_v14 = vcombine.low %v3061_v5, %v3077_v16  ;;  %v465_v22 = vrot.slane %v451_v31, %v3109_v51 }
  0xe0   : > { %v3173_v61 = vcombine.low %v458_v58, %v490_v3  ;;  %v3176_v63 = vcombine.high %v458_v58, %v490_v3  ;;  %v499_v26 = vcombine.high %v433_v57, %v449_v53  ;;  %v578_v28 = vrot.slane %v570_v60, %v3099_v36 }
  0xe1   : > { %v3188_v29 = vcombine.low %v465_v22, %v497_v62  ;;  %v506_v32 = vrot.slane %v498_v59, %v3109_v51  ;;  %v3191_v35 = vcombine.high %v465_v22, %v497_v62  ;;  %v467_v37 = vcombine.high %v401_v9, %v417_v17 }
  0xe2   : > { %833 = vperm.xlu1 %2755, %v3134_v34   ;;  %836 = vperm.xlu0 %2754, %v3138_v38   ;;  %v546_v39 = vrot.slane %v538_v14, %v3099_v36  ;;  %v474_v42 = vrot.slane %v466_v6, %v3109_v51  ;;  %v530_v43 = vrot.slane %v522_v25, %v3099_v36 }
  0xe3   : > { %v571_v44 = vcombine.high %v3089_v24, %v243_v8  ;;  %v618_v45 = vcombine.low %v562_v41, %v578_v28  ;;  %v513_v48 = vrot.slane %v499_v26, %v3109_v51  ;;  %v539_v52 = vcombine.high %v3061_v5, %v3077_v16  ;;  %v245_v16 = vpop.permute.xlu1 %244 }
  0xe4   : > { %v3200_v47 = vcombine.low %v474_v42, %v506_v32  ;;  %v3203_v50 = vcombine.high %v474_v42, %v506_v32  ;;  %v586_v54 = vcombine.low %v530_v43, %v546_v39  ;;  %v555_v21 = vcombine.high %v3083_v20, %v3096_v33 }
  0xe5   : > { %v481_v53 = vrot.slane %v467_v37, %v3109_v51  ;;  %v523_v24 = vcombine.high %v2992_v0, %v3071_v12  ;;  %v585_v55 = vrot.slane %v571_v44, %v3099_v36  ;;  %v619_v3 = vcombine.high %v562_v41, %v578_v28 }
  0xe6   : > { %839 = vperm.xlu1 %2755, %v3146_v46   ;;  %842 = vperm.xlu0 %2754, %v3151_v49   ;;  %v626_v5 = vrot.slane %v618_v45, %v3109_v51  ;;  %v553_v20 = vrot.slane %v539_v52, %v3099_v36  ;;  %v587_v33 = vcombine.high %v530_v43, %v546_v39 }
  0xe7   : > { %v3215_v9 = vcombine.low %v481_v53, %v513_v48  ;;  %v3218_v8 = vcombine.high %v481_v53, %v513_v48  ;;  %v569_v17 = vrot.slane %v555_v21, %v3099_v36  ;;  %v594_v0 = vrot.slane %v586_v54, %v3109_v51 }
  0xe8   : > { %v537_v12 = vrot.slane %v523_v24, %v3099_v36  ;;  %v706_v31 = vcombine.low %v3087_v23, %v245_v16  ;;  %v633_v59 = vrot.slane %v619_v3, %v3109_v51  ;;  %v658_v60 = vcombine.low %v3002_v2, %v3069_v11 }
  0xe9   : > { %v634_v57 = vcombine.low %v569_v17, %v585_v55  ;;  %v3227_v58 = vcombine.low %v594_v0, %v626_v5  ;;  %v3232_v62 = vcombine.high %v594_v0, %v626_v5  ;;  %v674_v6 = vcombine.low %v3063_v7, %v3075_v15 }
  0xea   : > { %845 = vperm.xlu1 %2755, %v3161_v56   ;;  %848 = vperm.xlu0 %2754, %v3165_v13   ;;  %v602_v14 = vcombine.low %v537_v12, %v553_v20  ;;  %v690_v18 = vcombine.low %v3081_v19, %v3103_v40  ;;  %v601_v22 = vrot.slane %v587_v33, %v3109_v51 }
  0xeb   : > { %v714_v25 = vrot.slane %v706_v31, %v3099_v36  ;;  %v635_v26 = vcombine.high %v569_v17, %v585_v55  ;;  %v642_v32 = vrot.slane %v634_v57, %v3109_v51  ;;  %v666_v37 = vrot.slane %v658_v60, %v3099_v36 }
  0xec   : > { %v3242_v28 = vcombine.low %v601_v22, %v633_v59  ;;  %v3246_v39 = vcombine.high %v601_v22, %v633_v59  ;;  %v682_v41 = vrot.slane %v674_v6, %v3099_v36  ;;  %v603_v42 = vcombine.high %v537_v12, %v553_v20 }
  0xed   : > { %v698_v43 = vrot.slane %v690_v18, %v3099_v36  ;;  %v610_v44 = vrot.slane %v602_v14, %v3109_v51  ;;  %v707_v45 = vcombine.high %v3087_v23, %v245_v16  ;;  %v649_v54 = vrot.slane %v635_v26, %v3109_v51 }
  0xee   : > { %851 = vperm.xlu1 %2755, %v3173_v61   ;;  %854 = vperm.xlu0 %2754, %v3176_v63   ;;  %v659_v21 = vcombine.high %v3002_v2, %v3069_v11  ;;  %v675_v24 = vcombine.high %v3063_v7, %v3075_v15  ;;  %v722_v55 = vcombine.low %v666_v37, %v682_v41 }
  0xef   : > { %v754_v48 = vcombine.low %v698_v43, %v714_v25  ;;  %v3254_v52 = vcombine.low %v610_v44, %v642_v32  ;;  %v3259_v53 = vcombine.high %v610_v44, %v642_v32  ;;  %v691_v3 = vcombine.high %v3081_v19, %v3103_v40  ;;  %v3296_v44 = vld [vmem:[%s2985_s23 + $0x1] ss:$2 sm:$0xff] }
  0xf0   : > { %v617_v23 = vrot.slane %v603_v42, %v3109_v51  ;;  %v721_v5 = vrot.slane %v707_v45, %v3099_v36  ;;  %v755_v16 = vcombine.high %v698_v43, %v714_v25  ;;  %v673_v11 = vrot.slane %v659_v21, %v3099_v36 }
  0xf1   : > { %v762_v2 = vrot.slane %v754_v48, %v3109_v51  ;;  %v689_v15 = vrot.slane %v675_v24, %v3099_v36  ;;  %v723_v33 = vcombine.high %v666_v37, %v682_v41  ;;  %v705_v19 = vrot.slane %v691_v3, %v3099_v36  ;;  %v3303_v48 = vld [vmem:[%s2985_s23 + $0x21] ss:$2 sm:$0xff] }
  0xf2   : > { %857 = vperm.xlu1 %2755, %v3188_v29   ;;  %860 = vperm.xlu0 %2754, %v3191_v35   ;;  %v3269_v20 = vcombine.low %v617_v23, %v649_v54  ;;  %v657_v7 = vcombine.high %v617_v23, %v649_v54  ;;  %v730_v40 = vrot.slane %v722_v55, %v3109_v51  ;;  %v4127_v45 = vmov 1  }
  0xf3   : > { %v770_v17 = vcombine.low %v705_v19, %v721_v5  ;;  %v769_v12 = vrot.slane %v755_v16, %v3109_v51  ;;  %v738_v57 = vcombine.low %v673_v11, %v689_v15  ;;  %v737_v59 = vrot.slane %v723_v33, %v3109_v51 }
  0xf4   : > { %v3277_v0 = vcombine.low %v730_v40, %v762_v2  ;;  %v787_v31 = vcombine.high %v730_v40, %v762_v2  ;;  %v771_v60 = vcombine.high %v705_v19, %v721_v5  ;;  %v739_v22 = vcombine.high %v673_v11, %v689_v15 }
  0xf5   : > { %v3282_v6 = vcombine.low %v737_v59, %v769_v12  ;;  %v778_v14 = vrot.slane %v770_v17, %v3109_v51  ;;  %v789_v18 = vcombine.high %v737_v59, %v769_v12  ;;  %v746_v25 = vrot.slane %v738_v57, %v3109_v51 }
  0xf6   : > { %863 = vperm.xlu1 %2755, %v3200_v47   ;;  %866 = vperm.xlu0 %2754, %v3203_v50   ;;  %v785_v32 = vrot.slane %v771_v60, %v3109_v51  ;;  %v753_v41 = vrot.slane %v739_v22, %v3109_v51  ;;  %v923_v23 = vand.u32 127, %v255_v27 }
  0xf7   : > { %v3287_v26 = vcombine.low %v746_v25, %v778_v14  ;;  %v791_v37 = vcombine.high %v746_v25, %v778_v14 }
  0xf8   : > { %v3292_v42 = vcombine.low %v753_v41, %v785_v32  ;;  %v793_v43 = vcombine.high %v753_v41, %v785_v32  ;;  %v928_v2 = vadd.s32 4294967288, %v923_v23  ;;  %v935_v11 = vadd.s32 4294967280, %v923_v23 }
  0xf9   : > { %v942_v33 = vadd.s32 4294967272, %v923_v23  ;;  %v3396_v40 = vsub.s32 %v923_v23, %v3092_v30  ;;  %v949_v17 = vadd.s32 4294967264, %v923_v23  ;;  %v956_v59 = vadd.s32 4294967256, %v923_v23 }
  0xfa   : > { %869 = vperm.xlu1 %2755, %v3215_v9   ;;  %872 = vperm.xlu0 %2754, %v3218_v8   ;;  %v3393_v19 = vsub.s32 %v928_v2, %v3092_v30  ;;  %v3399_v27 = vsub.s32 %v935_v11, %v3092_v30 }
  0xfb   : > { %4151 = vst [vmem:[#allocation9_spill] sm:$0xff] %v3396_v40  ;;  %v3404_v57 = vsub.s32 %v942_v33, %v3092_v30  ;;  %v3417_v32 = vsub.s32 %v949_v17, %v3092_v30 }
  0xfc   : > { %4150 = vst [vmem:[#allocation8_spill] sm:$0xff] %v3393_v19  ;;  %4152 = vst [vmem:[#allocation10_spill] sm:$0xff] %v3399_v27 }
  0xfd   : > { %4153 = vst [vmem:[#allocation11_spill] sm:$0xff] %v3404_v57  ;;  %4154 = vst [vmem:[#allocation12_spill] sm:$0xff] %v3417_v32 }
  0xfe   : > { %875 = vperm.xlu1 %2755, %v3227_v58   ;;  %878 = vperm.xlu0 %2754, %v3232_v62  }
 0x102   : > { %881 = vperm.xlu1 %2755, %v3242_v28   ;;  %884 = vperm.xlu0 %2754, %v3246_v39  }
 0x106   : > { %887 = vperm.xlu1 %2755, %v3254_v52   ;;  %890 = vperm.xlu0 %2754, %v3259_v53  }
 0x10a   : > { %893 = vperm.xlu1 %2755, %v3269_v20   ;;  %896 = vperm.xlu0 %2754, %v657_v7  }
 0x10e   : > { %899 = vperm.xlu1 %2755, %v3277_v0   ;;  %902 = vperm.xlu0 %2754, %v787_v31  }
 0x112   : > { %905 = vperm.xlu1 %2755, %v3282_v6   ;;  %908 = vperm.xlu0 %2754, %v789_v18  }
 0x116   : > { %911 = vperm.xlu1 %2755, %v3287_v26   ;;  %914 = vperm.xlu0 %2754, %v791_v37  }
 0x11a   : > { %917 = vperm.xlu1 %2755, %v3292_v42   ;;  %920 = vperm.xlu0 %2754, %v793_v43  }
 0x11e   : > { %2756 = vset.pattern.permute.xlu1 %v4127_v45  ;;  %1373 = vrot.lane.b32.xlu0 %v3296_v44, %s2873_s24 }
 0x11f   : > { %1104 = vperm.xlu1 %2756, %v3121_v10  }
 0x122   : > { %1377 = vrot.lane.b32.xlu0 %v3303_v48, %s2873_s24 }
 0x123   : > { %1110 = vperm.xlu1 %2756, %v3134_v34  }
 0x126   : > { %1385 = vrot.lane.b32.xlu0 %v3296_v44, %s2874_s18 }
 0x127   : > { %1113 = vperm.xlu1 %2756, %v3138_v38  }
 0x12a   : > { %1389 = vrot.lane.b32.xlu0 %v3303_v48, %s2874_s18 }
 0x12b   : > { %1119 = vperm.xlu1 %2756, %v3151_v49  }
 0x12e   : > { %1397 = vrot.lane.b32.xlu0 %v3296_v44, %s2875_s25 }
 0x12f   : > { %1125 = vperm.xlu1 %2756, %v3165_v13   ;;  %v3351_v13 = vld [vmem:[%s2985_s23 + $0x11] ss:$2 sm:$0xff] }
 0x132   : > { %1401 = vrot.lane.b32.xlu0 %v3303_v48, %s2875_s25 }
 0x133   : > { %1131 = vperm.xlu1 %2756, %v3176_v63  }
 0x136   : > { %1409 = vrot.lane.b32.xlu0 %v3296_v44, %s2876_s26 }
 0x137   : > { %1137 = vperm.xlu1 %2756, %v3191_v35  }
 0x13a   : > { %1413 = vrot.lane.b32.xlu0 %v3303_v48, %s2876_s26 }
 0x13b   : > { %1143 = vperm.xlu1 %2756, %v3203_v50   ;;  %v3360_v50 = vld [vmem:[%s2985_s23 + $0x31] ss:$2 sm:$0xff]  ;;  %s2794_s23 = scalar_lea.vmem %s2793_s22, 512 }
 0x13c   : > { %p2796_p3 = scmp.lt.s32.totalorder %s2794_s23, %s2788_s15 }
 0x13e   : > { %1421 = vrot.lane.b32.xlu0 %v3296_v44, %s2877_s27  ;;  %p2797_p5 = por %p2796_p3, %p2795_p1 }
 0x13f   : > { %1149 = vperm.xlu1 %2756, %v3218_v8  }
 0x140   : > { %p2798_p6 = pnand %p2797_p5, %p2791_p0 }
 0x142   : > { %1425 = vrot.lane.b32.xlu0 %v3303_v48, %s2877_s27 }
 0x143   : > { %1155 = vperm.xlu1 %2756, %v3232_v62  }
 0x146   : > { %1433 = vrot.lane.b32.xlu0 %v3296_v44, %s2878_s28 }
 0x147   : > { %1161 = vperm.xlu1 %2756, %v3246_v39  }
 0x14a   : > { %1437 = vrot.lane.b32.xlu0 %v3303_v48, %s2878_s28 }
 0x14b   : > { %1167 = vperm.xlu1 %2756, %v3259_v53  }
 0x14e   : > { %1445 = vrot.lane.b32.xlu0 %v3296_v44, %s2880_s29 }
 0x14f   : > { %1173 = vperm.xlu1 %2756, %v657_v7  }
 0x152   : > { %1449 = vrot.lane.b32.xlu0 %v3303_v48, %s2880_s29 }
 0x153   : > { %1179 = vperm.xlu1 %2756, %v787_v31  }
 0x157   : > { %1185 = vperm.xlu1 %2756, %v789_v18  }
 0x159   : > { %v3342_v10 = vpop.permute.xlu1 %830  ;;  %v3344_v34 = vpop.permute.xlu0 %827 }
 0x15a   : > { %v932_v60 = vrot.slane %v3342_v10, %v3393_v19  ;;  %v927_v14 = vrot.slane %v3344_v34, %v3396_v40 }
 0x15b   : > { %1191 = vperm.xlu1 %2756, %v791_v37  }
 0x15d   : > { %v3346_v38 = vpop.permute.xlu1 %833  ;;  %v3348_v49 = vpop.permute.xlu0 %836 }
 0x15e   : > { %v939_v25 = vrot.slane %v3346_v38, %v3399_v27  ;;  %v970_v38 = vadd.s32 4294967240, %v923_v23  ;;  %v946_v11 = vrot.slane %v3348_v49, %v3404_v57 }
 0x15f   : > { %1197 = vperm.xlu1 %2756, %v793_v43  }
 0x161   : > { %v3353_v63 = vpop.permute.xlu1 %839  ;;  %v3355_v35 = vpop.permute.xlu0 %842 }
 0x163   : > { %1375 = vrot.lane.b32.xlu1 %v3351_v13, %s2873_s24 }
 0x164   : > { %2757 = vset.pattern.permute.xlu1 %v2879_v4 }
 0x165   : > { %v3363_v8 = vpop.permute.xlu1 %845  ;;  %v3365_v62 = vpop.permute.xlu0 %848 }
 0x167   : > { %1379 = vrot.lane.b32.xlu1 %v3360_v50, %s2873_s24 }
 0x169   : > { %v852_v39 = vpop.permute.xlu1 %851  ;;  %v855_v54 = vpop.permute.xlu0 %854 }
 0x16a   : > { %v980_v18 = vrot.slane %v852_v39, %v3396_v40  ;;  %v984_v22 = vrot.slane %v855_v54, %v3393_v19  ;;  %v3427_v39 = vsub.s32 %v956_v59, %v3092_v30  ;;  %v963_v54 = vadd.s32 4294967248, %v923_v23 }
 0x16b   : > { %1387 = vrot.lane.b32.xlu1 %v3351_v13, %s2874_s18  ;;  %v953_v23 = vrot.slane %v3353_v63, %v3417_v32 }
 0x16c   : > { %4155 = vst [vmem:[#allocation13_spill] sm:$0xff] %v3427_v39 }
 0x16d   : > { %v858_v21 = vpop.permute.xlu1 %857  ;;  %v3371_v53 = vpop.permute.xlu0 %860 }
 0x16e   : > { %v989_v37 = vrot.slane %v858_v21, %v3399_v27  ;;  %v934_v21 = vsel %vm933_vm0, %v932_v60, %v927_v14 }
 0x16f   : > { %1391 = vrot.lane.b32.xlu1 %v3360_v50, %s2874_s18  ;;  %v941_v33 = vsel %vm940_vm1, %v939_v25, %v934_v21  ;;  %v3454_v25 = vsub.s32 %v963_v54, %v3092_v30 }
 0x171   : > { %v3375_v24 = vpop.permute.xlu1 %863  ;;  %v3377_v4 = vpop.permute.xlu0 %866  ;;  %4156 = vst [vmem:[#allocation14_spill] sm:$0xff] %v3454_v25 }
 0x172   : > { %v999_v17 = vrot.slane %v3375_v24, %v3417_v32  ;;  %v948_v24 = vsel %vm947_vm2, %v946_v11, %v941_v33 }
 0x173   : > { %1399 = vrot.lane.b32.xlu1 %v3351_v13, %s2875_s25 }
 0x175   : > { %v3381_v55 = vpop.permute.xlu1 %869  ;;  %v3383_v3 = vpop.permute.xlu0 %872 }
 0x176   : > { %v1009_v54 = vrot.slane %v3381_v55, %v3454_v25  ;;  %v967_v55 = vrot.slane %v3363_v8, %v3454_v25 }
 0x177   : > { %1403 = vrot.lane.b32.xlu1 %v3360_v50, %s2875_s25 }
 0x179   : > { %v876_v5 = vpop.permute.xlu1 %875  ;;  %v879_v16 = vpop.permute.xlu0 %878 }
 0x17a   : > { %v1019_v43 = vrot.slane %v876_v5, %v3396_v40  ;;  %v1023_v10 = vrot.slane %v879_v16, %v3393_v19  ;;  %v985_v5 = vsel %vm933_vm0, %v984_v22, %v980_v18  ;;  %v994_v16 = vrot.slane %v3371_v53, %v3404_v57 }
 0x17b   : > { %1411 = vrot.lane.b32.xlu1 %v3351_v13, %s2876_s26 }
 0x17c   : > { %v1024_v49 = vsel %vm933_vm0, %v1023_v10, %v1019_v43  ;;  %v955_v43 = vsel %vm954_vm3, %v953_v23, %v948_v24 }
 0x17d   : > { %v882_v7 = vpop.permute.xlu1 %881  ;;  %v885_v15 = vpop.permute.xlu0 %884 }
 0x17e   : > { %v1028_v2 = vrot.slane %v882_v7, %v3399_v27  ;;  %v990_v7 = vsel %vm940_vm1, %v989_v37, %v985_v5  ;;  %v1033_v60 = vrot.slane %v885_v15, %v3404_v57  ;;  %v3457_v37 = vsub.s32 %v970_v38, %v3092_v30 }
 0x17f   : > { %1415 = vrot.lane.b32.xlu1 %v3360_v50, %s2876_s26  ;;  %v995_v15 = vsel %vm947_vm2, %v994_v16, %v990_v7 }
 0x180   : > { %v1029_v53 = vsel %vm940_vm1, %v1028_v2, %v1024_v49  ;;  %4157 = vst [vmem:[#allocation15_spill] sm:$0xff] %v3457_v37  ;;  %v1000_v10 = vsel %vm954_vm3, %v999_v17, %v995_v15  ;;  %v1004_v2 = vrot.slane %v3377_v4, %v3427_v39 }
 0x181   : > { %v888_v12 = vpop.permute.xlu1 %887  ;;  %v3401_v31 = vpop.permute.xlu0 %890  ;;  %v1034_v11 = vsel %vm947_vm2, %v1033_v60, %v1029_v53  ;;  %v974_v53 = vrot.slane %v3365_v62, %v3457_v37 }
 0x182   : > { %v1038_v18 = vrot.slane %v888_v12, %v3417_v32  ;;  %v960_v12 = vrot.slane %v3355_v35, %v3427_v39  ;;  %v1043_v30 = vrot.slane %v3401_v31, %v3427_v39  ;;  %v1005_v7 = vsel %vm961_vm4, %v1004_v2, %v1000_v10 }
 0x183   : > { %1423 = vrot.lane.b32.xlu1 %v3351_v13, %s2877_s27 }
 0x184   : > { %v1039_v16 = vsel %vm954_vm3, %v1038_v18, %v1034_v11  ;;  %v962_v23 = vsel %vm961_vm4, %v960_v12, %v955_v43 }
 0x185   : > { %v3420_v41 = vpop.permute.xlu1 %893  ;;  %v3424_v34 = vpop.permute.xlu0 %896  ;;  %v1044_v49 = vsel %vm961_vm4, %v1043_v30, %v1039_v16 }
 0x186   : > { %v1048_v35 = vrot.slane %v3420_v41, %v3454_v25  ;;  %v1014_v41 = vrot.slane %v3383_v3, %v3457_v37  ;;  %v1053_v60 = vrot.slane %v3424_v34, %v3457_v37 }
 0x187   : > { %1427 = vrot.lane.b32.xlu1 %v3360_v50, %s2877_s27 }
 0x188   : > { %v1049_v18 = vsel %vm968_vm5, %v1048_v35, %v1044_v49 }
 0x189   : > { %v900_v59 = vpop.permute.xlu1 %899  ;;  %v903_v14 = vpop.permute.xlu0 %902  ;;  %v1054_v62 = vsel %vm975_vm6, %v1053_v60, %v1049_v18 }
 0x18a   : > { %v1058_v22 = vrot.slane %v900_v59, %v3396_v40  ;;  %v1062_v63 = vrot.slane %v903_v14, %v3393_v19  ;;  %v1010_v59 = vsel %vm968_vm5, %v1009_v54, %v1005_v7 }
 0x18b   : > { %1435 = vrot.lane.b32.xlu1 %v3351_v13, %s2878_s28  ;;  %v1015_v24 = vsel %vm975_vm6, %v1014_v41, %v1010_v59 }
 0x18c   : > { %v1063_v33 = vsel %vm933_vm0, %v1062_v63, %v1058_v22  ;;  %v969_v63 = vsel %vm968_vm5, %v967_v55, %v962_v23 }
 0x18d   : > { %v906_v21 = vpop.permute.xlu1 %905  ;;  %v909_v5 = vpop.permute.xlu0 %908  ;;  %v976_v10 = vsel %vm975_vm6, %v974_v53, %v969_v63 }
 0x18e   : > { %v1067_v38 = vrot.slane %v906_v21, %v3399_v27  ;;  %v1072_v4 = vrot.slane %v909_v5, %v3404_v57  ;;  %v1095_v54 = vsel %vm1094_vm7, %v1015_v24, %v976_v10 }
 0x18f   : > { %1439 = vrot.lane.b32.xlu1 %v3360_v50, %s2878_s28  ;;  %v1097_v30 = vsel %vm1096_vm8, %v1054_v62, %v1095_v54 }
 0x190   : > { %v1068_v31 = vsel %vm940_vm1, %v1067_v38, %v1063_v33 }
 0x191   : > { %v912_v17 = vpop.permute.xlu1 %911  ;;  %v915_v14 = vpop.permute.xlu0 %914  ;;  %v1073_v22 = vsel %vm947_vm2, %v1072_v4, %v1068_v31 }
 0x192   : > { %v1077_v8 = vrot.slane %v912_v17, %v3417_v32  ;;  %v1082_v3 = vrot.slane %v915_v14, %v3427_v39 }
 0x193   : > { %1447 = vrot.lane.b32.xlu1 %v3351_v13, %s2880_s29 }
 0x194   : > { %v1078_v34 = vsel %vm954_vm3, %v1077_v8, %v1073_v22 }
 0x195   : > { %v918_v15 = vpop.permute.xlu1 %917  ;;  %v921_v12 = vpop.permute.xlu0 %920  ;;  %v1083_v2 = vsel %vm961_vm4, %v1082_v3, %v1078_v34 }
 0x196   : > { %v1087_v43 = vrot.slane %v918_v15, %v3454_v25  ;;  %v1092_v21 = vrot.slane %v921_v12, %v3457_v37 }
 0x197   : > { %1451 = vrot.lane.b32.xlu1 %v3360_v50, %s2880_s29 }
 0x198   : > { %v1088_v11 = vsel %vm968_vm5, %v1087_v43, %v1083_v2 }
 0x199   : > { %v1093_v38 = vsel %vm975_vm6, %v1092_v21, %v1088_v11  ;;  %v1374_v16 = vpop.permute.xlu0 %1373 }
 0x19a   : > { %v1099_v5 = vsel %vm1098_vm9, %v1093_v38, %v1097_v30  ;;  %v3514_v35 = vpop.permute.xlu1 %1104 }
 0x19b   : > { %4158 = vst [vmem:[#allocation16_spill] sm:$0xff] %v3514_v35  ;;  %1102 = vst.msk [vmem:[%s3516_s2] sm:$0xf] %vm1101_vm10, %v1099_v5 }
 0x19d   : > { %v3520_v33 = vpop.permute.xlu0 %1377 }
 0x19e   : > { %v3522_v4 = vpop.permute.xlu1 %1110 }
 0x19f   : > { %4159 = vst [vmem:[#allocation17_spill] sm:$0xff] %v3522_v4 }
 0x1a1   : > { %v1386_v55 = vpop.permute.xlu0 %1385 }
 0x1a2   : > { %v3524_v31 = vpop.permute.xlu1 %1113  ;;  %v1457_v34 = vcombine.low %v3296_v44, %v1386_v55  ;;  %v1458_v54 = vcombine.high %v3296_v44, %v1386_v55 }
 0x1a3   : > { %4160 = vst [vmem:[#allocation18_spill] sm:$0xff] %v3524_v31 }
 0x1a4   : > { %v1465_v43 = vrot.slane %v1457_v34, %v3099_v36 }
 0x1a5   : > { %v3526_v23 = vpop.permute.xlu0 %1389 }
 0x1a6   : > { %v3528_v7 = vpop.permute.xlu1 %1119  ;;  %v1729_v19 = vcombine.low %v3303_v48, %v3526_v23 }
 0x1a7   : > { %4161 = vst [vmem:[#allocation19_spill] sm:$0xff] %v3528_v7 }
 0x1a9   : > { %v1398_v41 = vpop.permute.xlu0 %1397 }
 0x1aa   : > { %v3530_v17 = vpop.permute.xlu1 %1125  ;;  %v1473_v24 = vcombine.low %v1374_v16, %v1398_v41  ;;  %v1474_v11 = vcombine.high %v1374_v16, %v1398_v41 }
 0x1ab   : > { %4162 = vst [vmem:[#allocation20_spill] sm:$0xff] %v3530_v17 }
 0x1ac   : > { %v1481_v12 = vrot.slane %v1473_v24, %v3099_v36 }
 0x1ad   : > { %v3532_v59 = vpop.permute.xlu0 %1401 }
 0x1ae   : > { %v3534_v49 = vpop.permute.xlu1 %1131  ;;  %v1521_v30 = vcombine.low %v1465_v43, %v1481_v12  ;;  %v1522_v34 = vcombine.high %v1465_v43, %v1481_v12 }
 0x1af   : > { %4163 = vst [vmem:[#allocation21_spill] sm:$0xff] %v3534_v49 }
 0x1b0   : > { %v1529_v44 = vrot.slane %v1521_v30, %v3109_v51 }
 0x1b1   : > { %v1410_v60 = vpop.permute.xlu0 %1409 }
 0x1b2   : > { %v3536_v8 = vpop.permute.xlu1 %1137 }
 0x1b3   : > { %4164 = vst [vmem:[#allocation22_spill] sm:$0xff] %v3536_v8 }
 0x1b5   : > { %v3538_v14 = vpop.permute.xlu0 %1413 }
 0x1b6   : > { %v3540_v53 = vpop.permute.xlu1 %1143 }
 0x1b7   : > { %4165 = vst [vmem:[#allocation23_spill] sm:$0xff] %v3540_v53  ;;  %v1472_v53 = vrot.slane %v1458_v54, %v3099_v36 }
 0x1b9   : > { %v1422_v18 = vpop.permute.xlu0 %1421 }
 0x1ba   : > { %v3542_v22 = vpop.permute.xlu1 %1149 }
 0x1bb   : > { %4166 = vst [vmem:[#allocation24_spill] sm:$0xff] %v3542_v22 }
 0x1bd   : > { %v3544_v3 = vpop.permute.xlu0 %1425 }
 0x1be   : > { %v3546_v63 = vpop.permute.xlu1 %1155 }
 0x1bf   : > { %4167 = vst [vmem:[#allocation25_spill] sm:$0xff] %v3546_v63 }
 0x1c1   : > { %v1434_v15 = vpop.permute.xlu0 %1433 }
 0x1c2   : > { %v3549_v62 = vpop.permute.xlu1 %1161  ;;  %v1489_v21 = vcombine.low %v1410_v60, %v1434_v15  ;;  %v1490_v45 = vcombine.high %v1410_v60, %v1434_v15 }
 0x1c3   : > { %4168 = vst [vmem:[#allocation26_spill] sm:$0xff] %v3549_v62 }
 0x1c4   : > { %v1497_v17 = vrot.slane %v1489_v21, %v3099_v36  ;;  %v1504_v16 = vrot.slane %v1490_v45, %v3099_v36 }
 0x1c5   : > { %v3553_v10 = vpop.permute.xlu0 %1437 }
 0x1c6   : > { %v3555_v2 = vpop.permute.xlu1 %1167 }
 0x1c7   : > { %4169 = vst [vmem:[#allocation27_spill] sm:$0xff] %v3555_v2  ;;  %v1488_v2 = vrot.slane %v1474_v11, %v3099_v36 }
 0x1c9   : > { %v1446_v38 = vpop.permute.xlu0 %1445  ;;  %v1537_v12 = vcombine.low %v1472_v53, %v1488_v2  ;;  %v1538_v30 = vcombine.high %v1472_v53, %v1488_v2 }
 0x1ca   : > { %v3558_v5 = vpop.permute.xlu1 %1173  ;;  %v1505_v22 = vcombine.low %v1422_v18, %v1446_v38  ;;  %v1506_v7 = vcombine.high %v1422_v18, %v1446_v38 }
 0x1cb   : > { %4170 = vst [vmem:[#allocation28_spill] sm:$0xff] %v3558_v5 }
 0x1cc   : > { %v1513_v24 = vrot.slane %v1505_v22, %v3099_v36  ;;  %v1520_v55 = vrot.slane %v1506_v7, %v3099_v36  ;;  %v1536_v22 = vrot.slane %v1522_v34, %v3109_v51 }
 0x1cd   : > { %v1450_v57 = vpop.permute.xlu0 %1449 }
 0x1ce   : > { %v3564_v62 = vpop.permute.xlu1 %1179  ;;  %v1553_v41 = vcombine.low %v1497_v17, %v1513_v24  ;;  %v1554_v60 = vcombine.high %v1497_v17, %v1513_v24  ;;  %v1569_v21 = vcombine.low %v1504_v16, %v1520_v55  ;;  %v1570_v38 = vcombine.high %v1504_v16, %v1520_v55 }
 0x1cf   : > { %4171 = vst [vmem:[#allocation29_spill] sm:$0xff] %v3564_v62  ;;  %v1545_v24 = vrot.slane %v1537_v12, %v3109_v51 }
 0x1d0   : > { %v1561_v15 = vrot.slane %v1553_v41, %v3109_v51  ;;  %v1568_v18 = vrot.slane %v1554_v60, %v3109_v51  ;;  %v1577_v34 = vrot.slane %v1569_v21, %v3109_v51  ;;  %v1584_v41 = vrot.slane %v1570_v38, %v3109_v51 }
 0x1d2   : > { %v3572_v43 = vpop.permute.xlu1 %1185  ;;  %v3574_v54 = vcombine.high %v1529_v44, %v1561_v15  ;;  %v3576_v11 = vcombine.low %v1529_v44, %v1561_v15  ;;  %v3580_v45 = vcombine.low %v1536_v22, %v1568_v18  ;;  %v3582_v7 = vcombine.high %v1536_v22, %v1568_v18 }
 0x1d3   : > { %4172 = vst [vmem:[#allocation30_spill] sm:$0xff] %v3572_v43  ;;  %v3593_v60 = vcombine.low %v1545_v24, %v1577_v34  ;;  %v3595_v15 = vcombine.high %v1545_v24, %v1577_v34  ;;  %v1552_v18 = vrot.slane %v1538_v30, %v3109_v51 }
 0x1d4   : > { %2037 = vperm.xlu1 %2757, %v3574_v54   ;;  %2034 = vperm.xlu0 %2754, %v3576_v11  }
 0x1d5   : > { %v3600_v2 = vcombine.low %v1552_v18, %v1584_v41  ;;  %v3602_v16 = vcombine.high %v1552_v18, %v1584_v41 }
 0x1d6   : > { %v3584_v17 = vpop.permute.xlu1 %1191 }
 0x1d7   : > { %4173 = vst [vmem:[#allocation31_spill] sm:$0xff] %v3584_v17 }
 0x1d8   : > { %2040 = vperm.xlu1 %2757, %v3580_v45   ;;  %2043 = vperm.xlu0 %2754, %v3582_v7  }
 0x1da   : > { %v3590_v44 = vpop.permute.xlu1 %1197 }
 0x1db   : > { %4174 = vst [vmem:[#allocation32_spill] sm:$0xff] %v3590_v44 }
 0x1dc   : > { %2046 = vperm.xlu1 %2757, %v3593_v60   ;;  %2049 = vperm.xlu0 %2754, %v3595_v15  }
 0x1de   : > { %v1376_v53 = vpop.permute.xlu1 %1375 }
 0x1e0   : > { %2052 = vperm.xlu1 %2757, %v3600_v2   ;;  %2055 = vperm.xlu0 %2754, %v3602_v16  }
 0x1e2   : > { %v1380_v55 = vpop.permute.xlu1 %1379 }
 0x1e6   : > { %v1388_v22 = vpop.permute.xlu1 %1387 }
 0x1e7   : > { %v1593_v62 = vcombine.low %v3351_v13, %v1388_v22  ;;  %v1594_v32 = vcombine.high %v3351_v13, %v1388_v22  ;;  %v1745_v13 = vcombine.low %v3520_v33, %v3532_v59 }
 0x1ea   : > { %v1392_v12 = vpop.permute.xlu1 %1391 }
 0x1eb   : > { %v1865_v38 = vcombine.low %v3360_v50, %v1392_v12  ;;  %v1866_v30 = vcombine.high %v3360_v50, %v1392_v12 }
 0x1ed   : > { %v3609_v17 = vrot.slane %v1865_v38, %v3099_v36  ;;  %v3612_v41 = vrot.slane %v1866_v30, %v3099_v36 }
 0x1ee   : > { %v1400_v21 = vpop.permute.xlu1 %1399 }
 0x1ef   : > { %v1610_v12 = vcombine.high %v1376_v53, %v1400_v21 }
 0x1f2   : > { %v1404_v34 = vpop.permute.xlu1 %1403 }
 0x1f3   : > { %v1881_v24 = vcombine.low %v1380_v55, %v1404_v34  ;;  %v1882_v44 = vcombine.high %v1380_v55, %v1404_v34  ;;  %v1601_v55 = vrot.slane %v1593_v62, %v3099_v36  ;;  %v1624_v62 = vrot.slane %v1610_v12, %v3099_v36 }
 0x1f5   : > { %v3615_v18 = vrot.slane %v1881_v24, %v3099_v36  ;;  %v3618_v5 = vrot.slane %v1882_v44, %v3099_v36  ;;  %v1609_v24 = vcombine.low %v1376_v53, %v1400_v21 }
 0x1f6   : > { %v1412_v43 = vpop.permute.xlu1 %1411 }
 0x1f7   : > { %v1617_v31 = vrot.slane %v1609_v24, %v3099_v36 }
 0x1f9   : > { %v1657_v35 = vcombine.low %v1601_v55, %v1617_v31 }
 0x1fa   : > { %v3628_v38 = vpop.permute.xlu1 %1415 }
 0x1fb   : > { %v1665_v53 = vrot.slane %v1657_v35, %v3109_v51 }
 0x1fe   : > { %v1424_v30 = vpop.permute.xlu1 %1423 }
 0x202   : > { %v3630_v34 = vpop.permute.xlu1 %1427 }
 0x206   : > { %v1436_v44 = vpop.permute.xlu1 %1435 }
 0x207   : > { %v1625_v50 = vcombine.low %v1412_v43, %v1436_v44  ;;  %v1626_v37 = vcombine.high %v1412_v43, %v1436_v44 }
 0x209   : > { %v1633_v25 = vrot.slane %v1625_v50, %v3099_v36  ;;  %v1640_v43 = vrot.slane %v1626_v37, %v3099_v36  ;;  %v1737_v50 = vrot.slane %v1729_v19, %v3099_v36 }
 0x20a   : > { %v3632_v8 = vpop.permute.xlu1 %1439 }
 0x20e   : > { %v1448_v63 = vpop.permute.xlu1 %1447 }
 0x20f   : > { %v1641_v4 = vcombine.low %v1424_v30, %v1448_v63  ;;  %v1642_v49 = vcombine.high %v1424_v30, %v1448_v63  ;;  %v1658_v63 = vcombine.high %v1601_v55, %v1617_v31  ;;  %v1753_v55 = vrot.slane %v1745_v13, %v3099_v36 }
 0x211   : > { %v1649_v39 = vrot.slane %v1641_v4, %v3099_v36  ;;  %v1656_v27 = vrot.slane %v1642_v49, %v3099_v36  ;;  %v1761_v4 = vcombine.low %v3538_v14, %v3553_v10  ;;  %v1672_v37 = vrot.slane %v1658_v63, %v3109_v51 }
 0x212   : > { %v1730_v63 = vcombine.high %v3303_v48, %v3526_v23 }
 0x213   : > { %v1689_v40 = vcombine.low %v1633_v25, %v1649_v39  ;;  %v1690_v24 = vcombine.high %v1633_v25, %v1649_v39  ;;  %v1777_v39 = vcombine.low %v3544_v3, %v1450_v57  ;;  %v1608_v25 = vrot.slane %v1594_v32, %v3099_v36 }
 0x214   : > { %v1705_v22 = vcombine.low %v1640_v43, %v1656_v27  ;;  %v1769_v32 = vrot.slane %v1761_v4, %v3099_v36  ;;  %v1706_v30 = vcombine.high %v1640_v43, %v1656_v27  ;;  %v1793_v27 = vcombine.low %v1737_v50, %v1753_v55 }
 0x215   : > { %v1697_v21 = vrot.slane %v1689_v40, %v3109_v51  ;;  %v1704_v49 = vrot.slane %v1690_v24, %v3109_v51  ;;  %v1673_v40 = vcombine.low %v1608_v25, %v1624_v62  ;;  %v1785_v12 = vrot.slane %v1777_v39, %v3099_v36 }
 0x216   : > { %v1713_v44 = vrot.slane %v1705_v22, %v3109_v51  ;;  %v1674_v19 = vcombine.high %v1608_v25, %v1624_v62  ;;  %v1762_v43 = vcombine.high %v3538_v14, %v3553_v10  ;;  %v1778_v4 = vcombine.high %v3544_v3, %v1450_v57 }
 0x217   : > { %v3654_v31 = vcombine.low %v1665_v53, %v1697_v21  ;;  %v3656_v35 = vcombine.high %v1665_v53, %v1697_v21  ;;  %v3666_v24 = vcombine.low %v1672_v37, %v1704_v49  ;;  %v3668_v53 = vcombine.high %v1672_v37, %v1704_v49 }
 0x218   : > { %v1746_v21 = vcombine.high %v3520_v33, %v3532_v59  ;;  %v1681_v13 = vrot.slane %v1673_v40, %v3109_v51  ;;  %v1825_v39 = vcombine.low %v1769_v32, %v1785_v12  ;;  %v1720_v49 = vrot.slane %v1706_v30, %v3109_v51  ;;  %v1452_v30 = vpop.permute.xlu1 %1451 }
 0x219   : > { %2058 = vperm.xlu1 %2757, %v3654_v31   ;;  %2061 = vperm.xlu0 %2754, %v3656_v35   ;;  %v1744_v33 = vrot.slane %v1730_v63, %v3099_v36  ;;  %v1688_v62 = vrot.slane %v1674_v19, %v3109_v51  ;;  %v1794_v14 = vcombine.high %v1737_v50, %v1753_v55 }
 0x21a   : > { %v3681_v48 = vcombine.low %v1681_v13, %v1713_v44  ;;  %v3683_v23 = vcombine.high %v1681_v13, %v1713_v44  ;;  %v1760_v59 = vrot.slane %v1746_v21, %v3099_v36  ;;  %v1776_v57 = vrot.slane %v1762_v43, %v3099_v36 }
 0x21b   : > { %v1792_v3 = vrot.slane %v1778_v4, %v3099_v36  ;;  %v1801_v10 = vrot.slane %v1793_v27, %v3109_v51  ;;  %v1826_v25 = vcombine.high %v1769_v32, %v1785_v12  ;;  %v1833_v22 = vrot.slane %v1825_v39, %v3109_v51 }
 0x21c   : > { %v3694_v37 = vcombine.low %v1688_v62, %v1720_v49  ;;  %v3696_v40 = vcombine.high %v1688_v62, %v1720_v49  ;;  %v1809_v44 = vcombine.low %v1744_v33, %v1760_v59  ;;  %v1808_v55 = vrot.slane %v1794_v14, %v3109_v51 }
 0x21d   : > { %2064 = vperm.xlu1 %2757, %v3666_v24   ;;  %2067 = vperm.xlu0 %2754, %v3668_v53   ;;  %v1841_v50 = vcombine.low %v1776_v57, %v1792_v3  ;;  %v1840_v63 = vrot.slane %v1826_v25, %v3109_v51  ;;  %v1913_v21 = vcombine.low %v3630_v34, %v1452_v30 }
 0x21e   : > { %v3703_v32 = vcombine.high %v1801_v10, %v1833_v22  ;;  %v3705_v12 = vcombine.low %v1801_v10, %v1833_v22  ;;  %v1897_v19 = vcombine.low %v3628_v38, %v3632_v8  ;;  %v1810_v13 = vcombine.high %v1744_v33, %v1760_v59 }
 0x21f   : > { %v1842_v27 = vcombine.high %v1776_v57, %v1792_v3  ;;  %v1817_v43 = vrot.slane %v1809_v44, %v3109_v51  ;;  %v1849_v4 = vrot.slane %v1841_v50, %v3109_v51  ;;  %v1921_v39 = vrot.slane %v1913_v21, %v3099_v36 }
 0x220   : > { %v3714_v49 = vcombine.high %v1808_v55, %v1840_v63  ;;  %v3716_v62 = vcombine.low %v1808_v55, %v1840_v63  ;;  %v1905_v14 = vrot.slane %v1897_v19, %v3099_v36  ;;  %v1824_v33 = vrot.slane %v1810_v13, %v3109_v51 }
 0x221   : > { %2070 = vperm.xlu1 %2757, %v3681_v48   ;;  %2073 = vperm.xlu0 %2754, %v3683_v23   ;;  %v1856_v10 = vrot.slane %v1842_v27, %v3109_v51  ;;  %v1914_v59 = vcombine.high %v3630_v34, %v1452_v30  ;;  %v3724_v3 = vcombine.high %v1817_v43, %v1849_v4 }
 0x222   : > { %v1961_v57 = vcombine.low %v1905_v14, %v1921_v39  ;;  %v1861_v25 = vcombine.low %v1817_v43, %v1849_v4  ;;  %v1898_v22 = vcombine.high %v3628_v38, %v3632_v8  ;;  %v1962_v55 = vcombine.high %v1905_v14, %v1921_v39 }
 0x223   : > { %v3729_v44 = vcombine.high %v1824_v33, %v1856_v10  ;;  %v1928_v50 = vrot.slane %v1914_v59, %v3099_v36  ;;  %v1863_v21 = vcombine.low %v1824_v33, %v1856_v10  ;;  %v4175_v34 = vcombine.low %v3609_v17, %v3615_v18 }
 0x224   : > { %v1969_v63 = vrot.slane %v1961_v57, %v3109_v51  ;;  %v1912_v19 = vrot.slane %v1898_v22, %v3099_v36  ;;  %v1976_v8 = vrot.slane %v1962_v55, %v3109_v51  ;;  %v4176_v43 = vcombine.high %v3609_v17, %v3615_v18 }
 0x225   : > { %2076 = vperm.xlu1 %2757, %v3694_v37   ;;  %2079 = vperm.xlu0 %2754, %v3696_v40   ;;  %v1937_v30 = vrot.slane %v4175_v34, %v3109_v51  ;;  %v4177_v33 = vcombine.low %v3612_v41, %v3618_v5  ;;  %v4178_v22 = vcombine.high %v3612_v41, %v3618_v5  ;;  %v4179_v34 = vmov 1  }
 0x226   : > { %v1977_v38 = vcombine.low %v1912_v19, %v1928_v50  ;;  %v1944_v4 = vrot.slane %v4176_v43, %v3109_v51  ;;  %v1978_v39 = vcombine.high %v1912_v19, %v1928_v50 }
 0x227   : > { %v3740_v13 = vcombine.high %v1937_v30, %v1969_v63  ;;  %v1993_v27 = vcombine.low %v1937_v30, %v1969_v63  ;;  %v1953_v59 = vrot.slane %v4177_v33, %v3109_v51  ;;  %v1960_v50 = vrot.slane %v4178_v22, %v3109_v51  ;;  %v4185_v22 = vld [vmem:[#allocation13_spill] sm:$0xff] }
 0x228   : > { %v1985_v36 = vrot.slane %v1977_v38, %v3109_v51  ;;  %v3748_v14 = vcombine.high %v1944_v4, %v1976_v8  ;;  %v3750_v10 = vcombine.low %v1944_v4, %v1976_v8  ;;  %v1992_v17 = vrot.slane %v1978_v39, %v3109_v51  ;;  %v4184_v8 = vld [vmem:[#allocation12_spill] sm:$0xff] }
 0x229   : > { %2085 = vperm.xlu0 %2754, %v3703_v32   ;;  %2082 = vperm.xlu1 %2757, %v3705_v12  }
 0x22a   : > { %v3759_v18 = vcombine.high %v1953_v59, %v1985_v36  ;;  %v1997_v57 = vcombine.low %v1953_v59, %v1985_v36  ;;  %v2000_v55 = vcombine.high %v1960_v50, %v1992_v17  ;;  %v3766_v63 = vcombine.low %v1960_v50, %v1992_v17 }
 0x22d   : > { %2091 = vperm.xlu0 %2754, %v3714_v49   ;;  %2088 = vperm.xlu1 %2757, %v3716_v62  }
 0x231   : > { %2097 = vperm.xlu0 %2754, %v3724_v3   ;;  %2094 = vperm.xlu1 %2757, %v1861_v25  }
 0x235   : > { %2103 = vperm.xlu0 %2754, %v3729_v44   ;;  %2100 = vperm.xlu1 %2757, %v1863_v21  }
 0x239   : > { %2109 = vperm.xlu0 %2754, %v3740_v13   ;;  %2106 = vperm.xlu1 %2757, %v1993_v27  }
 0x23d   : > { %2115 = vperm.xlu0 %2754, %v3748_v14   ;;  %2112 = vperm.xlu1 %2757, %v3750_v10  }
 0x241   : > { %2121 = vperm.xlu0 %2754, %v3759_v18   ;;  %2118 = vperm.xlu1 %2757, %v1997_v57  }
 0x245   : > { %2127 = vperm.xlu0 %2754, %v2000_v55   ;;  %2124 = vperm.xlu1 %2757, %v3766_v63  }
 0x249   : > { %2758 = vset.pattern.permute.xlu0 %v4179_v34  ;;  %2759 = vset.pattern.permute.xlu1 %v4179_v34 }
 0x24a   : > { %1107 = vperm.xlu0 %2758, %v3119_v1   ;;  %2292 = vperm.xlu1 %2759, %v3576_v11  }
 0x24e   : > { %1116 = vperm.xlu0 %2758, %v3146_v46   ;;  %2298 = vperm.xlu1 %2759, %v3580_v45  }
 0x24f   : > { %v2038_v51 = vpop.permute.xlu1 %2037  ;;  %v2035_v1 = vpop.permute.xlu0 %2034 }
 0x252   : > { %1122 = vperm.xlu0 %2758, %v3161_v56   ;;  %2301 = vperm.xlu1 %2759, %v3582_v7  }
 0x253   : > { %v2041_v46 = vpop.permute.xlu1 %2040  ;;  %v3797_v56 = vpop.permute.xlu0 %2043 }
 0x256   : > { %1128 = vperm.xlu0 %2758, %v3173_v61   ;;  %2307 = vperm.xlu1 %2759, %v3595_v15   ;;  %v4180_v15 = vld [vmem:[#allocation8_spill] sm:$0xff] }
 0x257   : > { %v2047_v61 = vpop.permute.xlu1 %2046 }
 0x258   : > { %v2151_v38 = vrot.slane %v2047_v61, %v4184_v8 }
 0x25a   : > { %1134 = vperm.xlu0 %2758, %v3188_v29   ;;  %2313 = vperm.xlu1 %2759, %v3602_v16   ;;  %v3801_v29 = vpop.permute.xlu0 %2049  ;;  %v4181_v16 = vld [vmem:[#allocation9_spill] sm:$0xff] }
 0x25b   : > { %v2132_v41 = vrot.slane %v2035_v1, %v4181_v16  ;;  %v2156_v50 = vrot.slane %v3801_v29, %v4185_v22 }
 0x25e   : > { %1140 = vperm.xlu0 %2758, %v3200_v47   ;;  %2319 = vperm.xlu1 %2759, %v3656_v35   ;;  %v3805_v47 = vpop.permute.xlu1 %2052 }
 0x262   : > { %1146 = vperm.xlu0 %2758, %v3215_v9   ;;  %2325 = vperm.xlu1 %2759, %v3668_v53   ;;  %v3807_v9 = vpop.permute.xlu0 %2055 }
 0x266   : > { %1152 = vperm.xlu0 %2758, %v3227_v58   ;;  %2331 = vperm.xlu1 %2759, %v3683_v23  }
 0x26a   : > { %1158 = vperm.xlu0 %2758, %v3242_v28   ;;  %2343 = vperm.xlu1 %2759, %v3703_v32  }
 0x26e   : > { %1164 = vperm.xlu0 %2758, %v3254_v52   ;;  %2364 = vperm.xlu1 %2759, %v1993_v27  }
 0x272   : > { %1170 = vperm.xlu0 %2758, %v3269_v20   ;;  %2349 = vperm.xlu1 %2759, %v3714_v49  }
 0x276   : > { %1176 = vperm.xlu0 %2758, %v3277_v0   ;;  %2352 = vperm.xlu1 %2759, %v1861_v25   ;;  %v4183_v25 = vld [vmem:[#allocation11_spill] sm:$0xff] }
 0x27a   : > { %1182 = vperm.xlu0 %2758, %v3282_v6   ;;  %2334 = vperm.xlu1 %2759, %v3694_v37  }
 0x27e   : > { %1188 = vperm.xlu0 %2758, %v3287_v26   ;;  %2376 = vperm.xlu1 %2759, %v1997_v57  }
 0x282   : > { %1194 = vperm.xlu0 %2758, %v3292_v42   ;;  %2358 = vperm.xlu1 %2759, %v1863_v21  }
 0x286   : > { %2295 = vperm.xlu0 %2758, %v3574_v54   ;;  %2361 = vperm.xlu1 %2759, %v3729_v44   ;;  %v2146_v44 = vrot.slane %v3797_v56, %v4183_v25 }
 0x28a   : > { %2304 = vperm.xlu0 %2758, %v3593_v60   ;;  %2385 = vperm.xlu1 %2759, %v2000_v55  }
 0x28e   : > { %2310 = vperm.xlu0 %2758, %v3600_v2   ;;  %v2136_v2 = vrot.slane %v2038_v51, %v4180_v15 }
 0x292   : > { %2316 = vperm.xlu0 %2758, %v3654_v31  }
 0x294   : > { %v2059_v58 = vpop.permute.xlu1 %2058  ;;  %v2062_v28 = vpop.permute.xlu0 %2061 }
 0x295   : > { %v2171_v31 = vrot.slane %v2059_v58, %v4181_v16  ;;  %v2175_v35 = vrot.slane %v2062_v28, %v4180_v15 }
 0x296   : > { %2322 = vperm.xlu0 %2758, %v3666_v24   ;;  %v4182_v24 = vld [vmem:[#allocation10_spill] sm:$0xff] }
 0x297   : > { %v2141_v53 = vrot.slane %v2041_v46, %v4182_v24  ;;  %v2176_v21 = vsel %vm933_vm0, %v2175_v35, %v2171_v31  ;;  %v4186_v46 = vld [vmem:[#allocation14_spill] sm:$0xff] }
 0x298   : > { %v2065_v52 = vpop.permute.xlu1 %2064  ;;  %v2068_v20 = vpop.permute.xlu0 %2067 }
 0x299   : > { %v2185_v30 = vrot.slane %v2068_v20, %v4183_v25 }
 0x29a   : > { %2328 = vperm.xlu0 %2758, %v3681_v48   ;;  %v2180_v48 = vrot.slane %v2065_v52, %v4182_v24 }
 0x29c   : > { %v2071_v0 = vpop.permute.xlu1 %2070  ;;  %v3812_v6 = vpop.permute.xlu0 %2073 }
 0x29d   : > { %v2190_v27 = vrot.slane %v2071_v0, %v4184_v8  ;;  %v2195_v34 = vrot.slane %v3812_v6, %v4185_v22  ;;  %v2161_v0 = vrot.slane %v3805_v47, %v4186_v46 }
 0x29e   : > { %2340 = vperm.xlu0 %2758, %v3705_v12  }
 0x2a0   : > { %v3815_v26 = vpop.permute.xlu1 %2076  ;;  %v3817_v42 = vpop.permute.xlu0 %2079 }
 0x2a1   : > { %v2200_v56 = vrot.slane %v3815_v26, %v4186_v46 }
 0x2a2   : > { %2346 = vperm.xlu0 %2758, %v3716_v62   ;;  %v2137_v62 = vsel %vm933_vm0, %v2136_v2, %v2132_v41 }
 0x2a3   : > { %v2142_v19 = vsel %vm940_vm1, %v2141_v53, %v2137_v62 }
 0x2a4   : > { %v2083_v5 = vpop.permute.xlu1 %2082  ;;  %v2086_v54 = vpop.permute.xlu0 %2085  ;;  %v2147_v59 = vsel %vm947_vm2, %v2146_v44, %v2142_v19 }
 0x2a5   : > { %v2210_v32 = vrot.slane %v2083_v5, %v4181_v16  ;;  %v2214_v12 = vrot.slane %v2086_v54, %v4180_v15  ;;  %v2152_v57 = vsel %vm954_vm3, %v2151_v38, %v2147_v59  ;;  %v4187_v54 = vld [vmem:[#allocation15_spill] sm:$0xff] }
 0x2a6   : > { %2367 = vperm.xlu0 %2758, %v3740_v13   ;;  %v2181_v13 = vsel %vm940_vm1, %v2180_v48, %v2176_v21  ;;  %v2157_v26 = vsel %vm961_vm4, %v2156_v50, %v2152_v57  ;;  %v2166_v47 = vrot.slane %v3807_v9, %v4187_v54 }
 0x2a7   : > { %v2186_v17 = vsel %vm947_vm2, %v2185_v30, %v2181_v13 }
 0x2a8   : > { %v2089_v11 = vpop.permute.xlu1 %2088  ;;  %v2092_v45 = vpop.permute.xlu0 %2091  ;;  %v2191_v55 = vsel %vm954_vm3, %v2190_v27, %v2186_v17 }
 0x2a9   : > { %v2219_v49 = vrot.slane %v2089_v11, %v4182_v24  ;;  %v2224_v39 = vrot.slane %v2092_v45, %v4183_v25  ;;  %v2196_v5 = vsel %vm961_vm4, %v2195_v34, %v2191_v55  ;;  %v2205_v11 = vrot.slane %v3817_v42, %v4187_v54  ;;  %v4188_v34 = vld [vmem:[#allocation16_spill] sm:$0xff] }
 0x2aa   : > { %2370 = vperm.xlu0 %2758, %v3750_v10   ;;  %v2162_v42 = vsel %vm968_vm5, %v2161_v0, %v2157_v26 }
 0x2ab   : > { %v2167_v62 = vsel %vm975_vm6, %v2166_v47, %v2162_v42 }
 0x2ac   : > { %v2095_v7 = vpop.permute.xlu1 %2094  ;;  %v2098_v60 = vpop.permute.xlu0 %2097 }
 0x2ad   : > { %v2234_v61 = vrot.slane %v2098_v60, %v4185_v22  ;;  %v2201_v60 = vsel %vm968_vm5, %v2200_v56, %v2196_v5 }
 0x2ae   : > { %2373 = vperm.xlu0 %2758, %v3748_v14   ;;  %v2229_v14 = vrot.slane %v2095_v7, %v4184_v8 }
 0x2b0   : > { %v2101_v23 = vpop.permute.xlu1 %2100  ;;  %v2104_v37 = vpop.permute.xlu0 %2103 }
 0x2b1   : > { %v2239_v29 = vrot.slane %v2101_v23, %v4186_v46  ;;  %v2206_v23 = vsel %vm975_vm6, %v2205_v11, %v2201_v60  ;;  %v4192_v11 = vld [vmem:[#allocation18_spill] sm:$0xff] }
 0x2b2   : > { %2355 = vperm.xlu0 %2758, %v3724_v3   ;;  %v2215_v3 = vsel %vm933_vm0, %v2214_v12, %v2210_v32 }
 0x2b3   : > { %v2220_v36 = vsel %vm940_vm1, %v2219_v49, %v2215_v3 }
 0x2b4   : > { %v2107_v43 = vpop.permute.xlu1 %2106  ;;  %v2110_v4 = vpop.permute.xlu0 %2109 }
 0x2b5   : > { %v2249_v10 = vrot.slane %v2107_v43, %v4181_v16  ;;  %v2253_v33 = vrot.slane %v2110_v4, %v4180_v15 }
 0x2b6   : > { %2337 = vperm.xlu0 %2758, %v3696_v40   ;;  %v2225_v40 = vsel %vm947_vm2, %v2224_v39, %v2220_v36 }
 0x2b7   : > { %v2230_v28 = vsel %vm954_vm3, %v2229_v14, %v2225_v40  ;;  %v2254_v52 = vsel %vm933_vm0, %v2253_v33, %v2249_v10 }
 0x2b8   : > { %v2113_v51 = vpop.permute.xlu1 %2112  ;;  %v2116_v1 = vpop.permute.xlu0 %2115  ;;  %v2235_v2 = vsel %vm961_vm4, %v2234_v61, %v2230_v28 }
 0x2b9   : > { %v2258_v58 = vrot.slane %v2113_v51, %v4182_v24  ;;  %v2263_v20 = vrot.slane %v2116_v1, %v4183_v25  ;;  %v2240_v31 = vsel %vm968_vm5, %v2239_v29, %v2235_v2  ;;  %v1202_v51 = vrot.slane %v4188_v34, %v4181_v16  ;;  %v4198_v34 = vld [vmem:[#allocation19_spill] sm:$0xff] }
 0x2ba   : > { %2379 = vperm.xlu0 %2758, %v3759_v18   ;;  %v2244_v18 = vrot.slane %v2104_v37, %v4187_v54 }
 0x2bb   : > { %v2259_v6 = vsel %vm940_vm1, %v2258_v58, %v2254_v52  ;;  %v4189_v58 = vld [vmem:[#allocation21_spill] sm:$0xff] }
 0x2bc   : > { %v2119_v45 = vpop.permute.xlu1 %2118  ;;  %v2122_v7 = vpop.permute.xlu0 %2121  ;;  %v2264_v35 = vsel %vm947_vm2, %v2263_v20, %v2259_v6  ;;  %v2245_v12 = vsel %vm975_vm6, %v2244_v18, %v2240_v31  ;;  %v1245_v28 = vrot.slane %v4189_v58, %v4180_v15  ;;  %v4190_v20 = vld [vmem:[#allocation17_spill] sm:$0xff]  ;;  %v4193_v31 = vld [vmem:[#allocation22_spill] sm:$0xff] }
 0x2bd   : > { %v2268_v41 = vrot.slane %v2119_v45, %v4184_v8  ;;  %v2273_v53 = vrot.slane %v2122_v7, %v4185_v22  ;;  %v1211_v0 = vrot.slane %v4190_v20, %v4182_v24  ;;  %v4191_v6 = vld [vmem:[#allocation25_spill] sm:$0xff]  ;;  %v1216_v45 = vrot.slane %v4192_v11, %v4183_v25 }
 0x2be   : > { %2382 = vperm.xlu0 %2758, %v3766_v63   ;;  %v2285_v63 = vsel %vm1094_vm7, %v2206_v23, %v2167_v62  ;;  %v1284_v26 = vrot.slane %v4191_v6, %v4180_v15  ;;  %v4194_v23 = vld [vmem:[#allocation26_spill] sm:$0xff] }
 0x2bf   : > { %v2269_v48 = vsel %vm954_vm3, %v2268_v41, %v2264_v35  ;;  %v2286_v30 = vsel %vm1096_vm8, %v2245_v12, %v2285_v63  ;;  %v1255_v35 = vrot.slane %v4193_v31, %v4183_v25  ;;  %v4195_v12 = vld [vmem:[#allocation29_spill] sm:$0xff] }
 0x2c0   : > { %v2125_v37 = vpop.permute.xlu1 %2124  ;;  %v2128_v32 = vpop.permute.xlu0 %2127  ;;  %v2274_v44 = vsel %vm961_vm4, %v2273_v53, %v2269_v48 }
 0x2c1   : > { %v2278_v9 = vrot.slane %v2125_v37, %v4186_v46  ;;  %v2283_v49 = vrot.slane %v2128_v32, %v4187_v54  ;;  %v1294_v37 = vrot.slane %v4194_v23, %v4183_v25 }
 0x2c3   : > { %v2279_v21 = vsel %vm968_vm5, %v2278_v9, %v2274_v44  ;;  %v1323_v9 = vrot.slane %v4195_v12, %v4180_v15 }
 0x2c4   : > { %v2284_v19 = vsel %vm975_vm6, %v2283_v49, %v2279_v21 }
 0x2c5   : > { %v2287_v38 = vsel %vm1098_vm9, %v2284_v19, %v2286_v30  ;;  %v1108_v13 = vpop.permute.xlu0 %1107  ;;  %v3901_v39 = vpop.permute.xlu1 %2292 }
 0x2c6   : > { %2668 = vst.msk [vmem:[%s3516_s2 + $0x8] sm:$0xf] %vm1101_vm10, %v2287_v38  ;;  %v1206_v55 = vrot.slane %v1108_v13, %v4180_v15  ;;  %v4196_v13 = vld [vmem:[#allocation23_spill] sm:$0xff] }
 0x2c8   : > { %v1207_v29 = vsel %vm933_vm0, %v1206_v55, %v1202_v51  ;;  %v1226_v51 = vrot.slane %v4198_v34, %v4185_v22 }
 0x2c9   : > { %v1117_v27 = vpop.permute.xlu0 %1116  ;;  %v3903_v10 = vpop.permute.xlu1 %2298  ;;  %v1212_v2 = vsel %vm940_vm1, %v1211_v0, %v1207_v29 }
 0x2ca   : > { %v1221_v32 = vrot.slane %v1117_v27, %v4184_v8  ;;  %v1217_v49 = vsel %vm947_vm2, %v1216_v45, %v1212_v2  ;;  %v1265_v27 = vrot.slane %v4196_v13, %v4185_v22  ;;  %v4202_v2 = vld [vmem:[#allocation20_spill] sm:$0xff] }
 0x2cd   : > { %v3899_v43 = vpop.permute.xlu0 %1122  ;;  %v3905_v59 = vpop.permute.xlu1 %2301 }
 0x2d1   : > { %v1129_v4 = vpop.permute.xlu0 %1128  ;;  %v3907_v50 = vpop.permute.xlu1 %2307 }
 0x2d2   : > { %v1241_v1 = vrot.slane %v1129_v4, %v4181_v16 }
 0x2d4   : > { %v1246_v7 = vsel %vm933_vm0, %v1245_v28, %v1241_v1  ;;  %v4199_v1 = vld [vmem:[#allocation30_spill] sm:$0xff] }
 0x2d5   : > { %v1135_v3 = vpop.permute.xlu0 %1134  ;;  %v3923_v5 = vpop.permute.xlu1 %2313 }
 0x2d6   : > { %v1250_v40 = vrot.slane %v1135_v3, %v4182_v24 }
 0x2d8   : > { %v1251_v18 = vsel %vm940_vm1, %v1250_v40, %v1246_v7  ;;  %v1333_v40 = vrot.slane %v4199_v1, %v4183_v25 }
 0x2d9   : > { %v1141_v36 = vpop.permute.xlu0 %1140  ;;  %v1256_v62 = vsel %vm947_vm2, %v1255_v35, %v1251_v18  ;;  %v3944_v63 = vpop.permute.xlu1 %2319  ;;  %v1236_v18 = vrot.slane %v4202_v2, %v4187_v54 }
 0x2da   : > { %v1260_v41 = vrot.slane %v1141_v36, %v4184_v8 }
 0x2dc   : > { %v1261_v21 = vsel %vm954_vm3, %v1260_v41, %v1256_v62  ;;  %v4203_v41 = vld [vmem:[#allocation31_spill] sm:$0xff] }
 0x2dd   : > { %v1147_v14 = vpop.permute.xlu0 %1146  ;;  %v2326_v7 = vpop.permute.xlu1 %2325 }
 0x2de   : > { %v1270_v30 = vrot.slane %v1147_v14, %v4186_v46  ;;  %v1231_v14 = vrot.slane %v3899_v43, %v4186_v46 }
 0x2e1   : > { %v1153_v33 = vpop.permute.xlu0 %1152 }
 0x2e2   : > { %v1280_v61 = vrot.slane %v1153_v33, %v4181_v16  ;;  %v4197_v33 = vld [vmem:[#allocation27_spill] sm:$0xff] }
 0x2e4   : > { %v1285_v47 = vsel %vm933_vm0, %v1284_v26, %v1280_v61  ;;  %v4201_v26 = vld [vmem:[#allocation28_spill] sm:$0xff] }
 0x2e5   : > { %v1159_v17 = vpop.permute.xlu0 %1158  ;;  %v1314_v11 = vrot.slane %v4201_v26, %v4187_v54  ;;  %v2404_v26 = vrot.slane %v3905_v59, %v4183_v25 }
 0x2e6   : > { %v1289_v52 = vrot.slane %v1159_v17, %v4182_v24  ;;  %v1304_v17 = vrot.slane %v4197_v33, %v4185_v22 }
 0x2e8   : > { %v1290_v53 = vsel %vm940_vm1, %v1289_v52, %v1285_v47  ;;  %v4200_v52 = vld [vmem:[#allocation24_spill] sm:$0xff]  ;;  %v1343_v47 = vrot.slane %v4203_v41, %v4185_v22 }
 0x2e9   : > { %v1165_v57 = vpop.permute.xlu0 %1164  ;;  %v1295_v19 = vsel %vm947_vm2, %v1294_v37, %v1290_v53  ;;  %v1275_v43 = vrot.slane %v4200_v52, %v4187_v54  ;;  %v2433_v52 = vrot.slane %v3944_v63, %v4180_v15  ;;  %v2443_v63 = vrot.slane %v2326_v7, %v4183_v25 }
 0x2ea   : > { %v1299_v42 = vrot.slane %v1165_v57, %v4184_v8  ;;  %v1222_v57 = vsel %vm954_vm3, %v1221_v32, %v1217_v49 }
 0x2eb   : > { %v1227_v20 = vsel %vm961_vm4, %v1226_v51, %v1222_v57 }
 0x2ec   : > { %v1300_v4 = vsel %vm954_vm3, %v1299_v42, %v1295_v19  ;;  %v1232_v45 = vsel %vm968_vm5, %v1231_v14, %v1227_v20 }
 0x2ed   : > { %v1171_v56 = vpop.permute.xlu0 %1170  ;;  %v1305_v28 = vsel %vm961_vm4, %v1304_v17, %v1300_v4  ;;  %v1237_v37 = vsel %vm975_vm6, %v1236_v18, %v1232_v45 }
 0x2ee   : > { %v1309_v3 = vrot.slane %v1171_v56, %v4186_v46  ;;  %v1266_v56 = vsel %vm961_vm4, %v1265_v27, %v1261_v21  ;;  %v2332_v21 = vpop.permute.xlu1 %2331 }
 0x2ef   : > { %v1271_v58 = vsel %vm968_vm5, %v1270_v30, %v1266_v56  ;;  %v2453_v7 = vrot.slane %v2332_v21, %v4185_v22 }
 0x2f0   : > { %v1310_v0 = vsel %vm968_vm5, %v1309_v3, %v1305_v28  ;;  %v1276_v31 = vsel %vm975_vm6, %v1275_v43, %v1271_v58 }
 0x2f1   : > { %v1177_v60 = vpop.permute.xlu0 %1176  ;;  %v1315_v53 = vsel %vm975_vm6, %v1314_v11, %v1310_v0  ;;  %v1355_v12 = vsel %vm1094_vm7, %v1276_v31, %v1237_v37 }
 0x2f2   : > { %v1319_v48 = vrot.slane %v1177_v60, %v4181_v16  ;;  %v1356_v49 = vsel %vm1096_vm8, %v1315_v53, %v1355_v12 }
 0x2f4   : > { %v1324_v36 = vsel %vm933_vm0, %v1323_v9, %v1319_v48  ;;  %v4204_v48 = vld [vmem:[#allocation32_spill] sm:$0xff] }
 0x2f5   : > { %v1183_v44 = vpop.permute.xlu0 %1182  ;;  %v1353_v23 = vrot.slane %v4204_v48, %v4187_v54 }
 0x2f6   : > { %v1328_v38 = vrot.slane %v1183_v44, %v4182_v24 }
 0x2f8   : > { %v1329_v55 = vsel %vm940_vm1, %v1328_v38, %v1324_v36  ;;  %v2344_v38 = vpop.permute.xlu1 %2343 }
 0x2f9   : > { %v1189_v61 = vpop.permute.xlu0 %1188  ;;  %v1334_v6 = vsel %vm947_vm2, %v1333_v40, %v1329_v55  ;;  %v2390_v40 = vrot.slane %v3901_v39, %v4181_v16  ;;  %v2472_v11 = vrot.slane %v2344_v38, %v4180_v15 }
 0x2fa   : > { %v1338_v29 = vrot.slane %v1189_v61, %v4184_v8 }
 0x2fc   : > { %v1339_v60 = vsel %vm954_vm3, %v1338_v29, %v1334_v6  ;;  %v2365_v4 = vpop.permute.xlu1 %2364  ;;  %v2399_v29 = vrot.slane %v3903_v10, %v4182_v24 }
 0x2fd   : > { %v1195_v35 = vpop.permute.xlu0 %1194  ;;  %v1344_v32 = vsel %vm961_vm4, %v1343_v47, %v1339_v60  ;;  %v2507_v48 = vrot.slane %v2365_v4, %v4181_v16 }
 0x2fe   : > { %v1348_v42 = vrot.slane %v1195_v35, %v4186_v46  ;;  %v2414_v35 = vrot.slane %v3907_v50, %v4185_v22 }
 0x300   : > { %v1349_v9 = vsel %vm968_vm5, %v1348_v42, %v1344_v32  ;;  %v2350_v36 = vpop.permute.xlu1 %2349 }
 0x301   : > { %v1354_v62 = vsel %vm975_vm6, %v1353_v23, %v1349_v9  ;;  %v2296_v44 = vpop.permute.xlu0 %2295  ;;  %v2482_v53 = vrot.slane %v2350_v36, %v4183_v25 }
 0x302   : > { %v1357_v30 = vsel %vm1098_vm9, %v1354_v62, %v1356_v49  ;;  %v2394_v51 = vrot.slane %v2296_v44, %v4180_v15 }
 0x303   : > { %2663 = vst.msk [vmem:[%s3516_s2 + $0x4] sm:$0xf] %vm1101_vm10, %v1357_v30 }
 0x304   : > { %v2353_v57 = vpop.permute.xlu1 %2352  ;;  %v2395_v58 = vsel %vm933_vm0, %v2394_v51, %v2390_v40 }
 0x305   : > { %v2305_v19 = vpop.permute.xlu0 %2304  ;;  %v2400_v0 = vsel %vm940_vm1, %v2399_v29, %v2395_v58  ;;  %v2487_v44 = vrot.slane %v2353_v57, %v4184_v8 }
 0x306   : > { %v2409_v2 = vrot.slane %v2305_v19, %v4184_v8  ;;  %v2405_v41 = vsel %vm947_vm2, %v2404_v26, %v2400_v0  ;;  %v2424_v19 = vrot.slane %v3923_v5, %v4187_v54 }
 0x308   : > { %v2335_v55 = vpop.permute.xlu1 %2334  ;;  %v2410_v23 = vsel %vm954_vm3, %v2409_v2, %v2405_v41 }
 0x309   : > { %v2311_v13 = vpop.permute.xlu0 %2310  ;;  %v2415_v38 = vsel %vm961_vm4, %v2414_v35, %v2410_v23 }
 0x30a   : > { %v2419_v9 = vrot.slane %v2311_v13, %v4186_v46 }
 0x30c   : > { %v3999_v56 = vpop.permute.xlu1 %2376  ;;  %v2420_v4 = vsel %vm968_vm5, %v2419_v9, %v2415_v38 }
 0x30d   : > { %v2317_v27 = vpop.permute.xlu0 %2316 }
 0x30e   : > { %v2429_v61 = vrot.slane %v2317_v27, %v4181_v16 }
 0x310   : > { %v2434_v39 = vsel %vm933_vm0, %v2433_v52, %v2429_v61  ;;  %v2359_v45 = vpop.permute.xlu1 %2358 }
 0x311   : > { %v2323_v3 = vpop.permute.xlu0 %2322 }
 0x312   : > { %v2438_v28 = vrot.slane %v2323_v3, %v4182_v24 }
 0x314   : > { %v2439_v10 = vsel %vm940_vm1, %v2438_v28, %v2434_v39  ;;  %v2362_v12 = vpop.permute.xlu1 %2361 }
 0x315   : > { %v2329_v33 = vpop.permute.xlu0 %2328  ;;  %v2444_v31 = vsel %vm947_vm2, %v2443_v63, %v2439_v10  ;;  %v2502_v40 = vrot.slane %v2362_v12, %v4187_v54 }
 0x316   : > { %v2448_v60 = vrot.slane %v2329_v33, %v4184_v8  ;;  %v2497_v33 = vrot.slane %v2359_v45, %v4186_v46 }
 0x318   : > { %v2449_v42 = vsel %vm954_vm3, %v2448_v60, %v2444_v31 }
 0x319   : > { %v2341_v17 = vpop.permute.xlu0 %2340  ;;  %v2454_v21 = vsel %vm961_vm4, %v2453_v7, %v2449_v42 }
 0x31a   : > { %v2468_v20 = vrot.slane %v2341_v17, %v4181_v16 }
 0x31c   : > { %v2473_v47 = vsel %vm933_vm0, %v2472_v11, %v2468_v20 }
 0x31d   : > { %v2347_v14 = vpop.permute.xlu0 %2346 }
 0x31e   : > { %v2477_v6 = vrot.slane %v2347_v14, %v4182_v24  ;;  %v2526_v14 = vrot.slane %v3999_v56, %v4184_v8 }
 0x320   : > { %v2478_v59 = vsel %vm940_vm1, %v2477_v6, %v2473_v47 }
 0x321   : > { %v2368_v34 = vpop.permute.xlu0 %2367  ;;  %v2483_v49 = vsel %vm947_vm2, %v2482_v53, %v2478_v59 }
 0x322   : > { %v2511_v37 = vrot.slane %v2368_v34, %v4180_v15  ;;  %v2458_v15 = vrot.slane %v2335_v55, %v4186_v46  ;;  %v2386_v55 = vpop.permute.xlu1 %2385  ;;  %v2425_v34 = vsel %vm975_vm6, %v2424_v19, %v2420_v4 }
 0x323   : > { %v2541_v8 = vrot.slane %v2386_v55, %v4187_v54 }
 0x324   : > { %v2512_v13 = vsel %vm933_vm0, %v2511_v37, %v2507_v48  ;;  %v2459_v36 = vsel %vm968_vm5, %v2458_v15, %v2454_v21 }
 0x325   : > { %v2371_v1 = vpop.permute.xlu0 %2370 }
 0x326   : > { %v2516_v50 = vrot.slane %v2371_v1, %v4182_v24  ;;  %v2488_v24 = vsel %vm954_vm3, %v2487_v44, %v2483_v49 }
 0x329   : > { %v2374_v43 = vpop.permute.xlu0 %2373 }
 0x32a   : > { %v2521_v16 = vrot.slane %v2374_v43, %v4183_v25  ;;  %v2517_v25 = vsel %vm940_vm1, %v2516_v50, %v2512_v13 }
 0x32c   : > { %v2522_v5 = vsel %vm947_vm2, %v2521_v16, %v2517_v25 }
 0x32d   : > { %v2356_v18 = vpop.permute.xlu0 %2355 }
 0x32e   : > { %v2492_v62 = vrot.slane %v2356_v18, %v4185_v22 }
 0x330   : > { %v2493_v3 = vsel %vm961_vm4, %v2492_v62, %v2488_v24 }
 0x331   : > { %v2338_v32 = vpop.permute.xlu0 %2337  ;;  %v2498_v51 = vsel %vm968_vm5, %v2497_v33, %v2493_v3 }
 0x332   : > { %v2463_v30 = vrot.slane %v2338_v32, %v4187_v54  ;;  %v2503_v28 = vsel %vm975_vm6, %v2502_v40, %v2498_v51 }
 0x334   : > { %v2464_v17 = vsel %vm975_vm6, %v2463_v30, %v2459_v36 }
 0x335   : > { %v2380_v27 = vpop.permute.xlu0 %2379  ;;  %v2543_v61 = vsel %vm1094_vm7, %v2464_v17, %v2425_v34 }
 0x336   : > { %v2531_v57 = vrot.slane %v2380_v27, %v4185_v22  ;;  %v2527_v22 = vsel %vm954_vm3, %v2526_v14, %v2522_v5 }
 0x338   : > { %v2532_v56 = vsel %vm961_vm4, %v2531_v57, %v2527_v22 }
 0x339   : > { %v2383_v1 = vpop.permute.xlu0 %2382 }
 0x33a   : > { %v2536_v58 = vrot.slane %v2383_v1, %v4186_v46  ;;  %v2544_v46 = vsel %vm1096_vm8, %v2503_v28, %v2543_v61 }
 0x33c   : > { %v2537_v29 = vsel %vm968_vm5, %v2536_v58, %v2532_v56 }
 0x33d   : > { %v2542_v54 = vsel %vm975_vm6, %v2541_v8, %v2537_v29 }
 0x33e   : > { %v2545_v52 = vsel %vm1098_vm9, %v2542_v54, %v2544_v46 }
 0x33f   : > { %2669 = vst.msk [vmem:[%s3516_s2 + $0xc] sm:$0xf] %vm1101_vm10, %v2545_v52 }
 0x340   : > { %2801 = shalt.err (!%p2798_p6)
}
 0x341   : > { %s2802_s24 = scalar_lea.hbm %s4070_s12, 256  ;;  %s2806_s26 = scalar_lea.hbm %s4126_s1, 512 }
 0x342   : > { %p2803_p7 = scmp.ne.s32.totalorder %s4070_s12, %s2802_s24  ;;  %p2807_p13 = scmp.lt.s32.totalorder %s4070_s12, %s4126_s1 }
 0x343   : > { %p2808_p2 = scmp.lt.s32.totalorder %s2806_s26, %s2802_s24 }
 0x344   : > { %p2804_p10 = pnand %p2803_p7, %p2948_p9 }
 0x345   : > { %p2809_p8 = por %p2808_p2, %p2807_p13 }
 0x346   : > { %p2805_p4 = pneg %p2804_p10 }
 0x348   : > { %p2810_p12 = pnand %p2809_p8, %p2805_p4 }
 0x34a   : > { %2813 = shalt.err (!%p2810_p12)
}
 0x34b   : > { %s2885_s29 = smov 64   ;;  %s2886_s30 = smov 4  }
 0x34c   : > { %2679 = dma.vmem_to_hbm [thread:$0]  (%p2948_p9), %s4072_s4, 256, %s4070_s12, %s2550_s13, %s2885_s29, %s2885_s29, %s2886_s30  }
 0x34d PF: > { %s2579_s2 = sand.u32 1, %s2848_s6   ;;  %p4205_p0 = scmp.ge.s32.totalorder %s2868_s11, 2 }
 0x34e   : > { %s2580_s3 = scalar_lea.sflag [#allocation4], %s2579_s2 }
 0x34f   : > { %p2686_p1 = pnand %p4205_p0, %p2955_p11 }
 0x351   : > { %p2687_p3 = pneg %p2686_p1 }
 0x353   : > { %2843 = dma.done.wait (%p2687_p3), %s2580_s3, 256  }
 0x354   : > { %2845 = vsyncadd (%p2687_p3), %s2580_s3, 4294967040  ;;  %s17_s11 = sadd.s32 1, %s2868_s11   ;;  %s4206_s6 = smov %s2852_s7 }
 0x355   : > { %p14_p5 = scmp.ge.s32.totalorder %s17_s11, 4   ;;  %s4207_s7 = smov %s2856_s8 }
 0x356   : > { %s4208_s8 = smov %s2953_s20  ;;  %s4209_s9 = smov %s2864_s10 }
 0x357   : > { %s4210_s10 = smov %s4212_s14  ;;  %16 = sbr.rel (!%p14_p5) target bundleno = 6 (0x6), region = 79 }
 0x35c   :  { %2585 = vsyncpa [#allocation3], 1 }
 0x35d   :  { %2587 = vsyncpa [#allocation3 + $0x1], 1 }
 0x35e   :  { %2588 = vsyncpa [#allocation4], 1 }
 0x35f   :  { %2590 = vsyncpa [#allocation4 + $0x1], 1 }

</bundles_post_ra>
